<compile_context>
chip_gen: v7x
topology: tpu7x:2x2x1
jax: 0.10.0
libtpu: 0.0.40
codegen_flags: <defaults>
</compile_context>

<pallas_src>
import functools

import jax
import jax.numpy as jnp
from jax import lax
from jax.experimental import pallas as pl
from jax.experimental.pallas import tpu as pltpu


def _round_up(x, m):
    return ((x + m - 1) // m) * m


def _vmem_limit_bytes():
    """Generation-aware VMEM limit (~80% of physical; ~51 MiB v7x, ~102 MiB v5e/v6e)."""
    try:
        cap = pltpu.get_tpu_info().vmem_capacity_bytes
        return int(min(cap * 8 // 10, 110 * 1024 * 1024))
    except Exception:
        return 48 * 1024 * 1024


# ---------------------------------------------------------------------------
# Fused kernel.  Grid = (phase, n_tile); the grid is a sequential loop with the last axis
# fastest, so all N tiles of a phase complete before the next phase starts:
#   phase 0: node-weight MLP (once), hyperedge degree B, he1 += H_tile^T @ (edge_rep @ Θ1)
#   phase 1: e1_tile = sigmoid(D^-1 H diag(w/B) he1 + b1);  he2 += H_tile^T @ (e1 @ Θ2)
#   phase 2: out_tile = sigmoid(D^-1 H diag(w/B) he2 + b2)  (bf16, lane-dense stores)
# ---------------------------------------------------------------------------
def _hyper_weight_kernel(xin_t_ref, w1t_ref, b1_ref, w2_ref, b2_ref,
                         h_ref, er_ref, th1_ref, bi1_ref, th2_ref, bi2_ref,
                         o_ref,
                         nw_scr, deg_scr, scale_scr, he1_scr, he2_scr,
                         *, e1_valid_cols):
    f32, bf16 = jnp.float32, jnp.bfloat16
    phase = pl.program_id(0)
    i = pl.program_id(1)

    h_bf = h_ref[...]                       # [tn, Mp] bf16 incidence tile
    h_f = h_bf.astype(f32)

    def row_scaled_agg(he_scr):
        """D^-1 * (H * diag(w/B)) @ he for the current N tile (pre-bias, pre-sigmoid)."""
        dn = jnp.sum(h_f * nw_scr[...], axis=1, keepdims=True)            # [tn, 1]  D_n
        n_pos = dn > 0.0
        inv_dn = jnp.where(
            n_pos, pl.reciprocal(jnp.where(n_pos, dn, 1.0), approx=True), 0.0)
        h_scaled = (h_f * scale_scr[...]).astype(bf16)                     # [tn, Mp]
        agg = jnp.dot(h_scaled, he_scr[...].astype(bf16),
                      preferred_element_type=f32)                          # [tn, P]
        return agg * inv_dn

    def accumulate_he(he_scr, x_bf, theta_ref):
        """he += H_tile^T @ (x @ Theta) without materialising H^T (transposed-LHS dot)."""
        xt = jnp.dot(x_bf, theta_ref[...], preferred_element_type=f32)     # [tn, P]
        he_scr[...] += lax.dot_general(
            h_bf, xt.astype(bf16), (((0,), (0,)), ((), ())),
            preferred_element_type=f32)                                    # [Mp, P]

    # ---------------- phase 0: MLP head, degrees, he1 accumulation ----------------
    @pl.when(phase == 0)
    def _phase0():
        @pl.when(i == 0)
        def _init():
            # node-weight MLP: Linear -> ReLU -> Dropout(id) -> Linear -> Sigmoid,
            # computed hyperedge-major so the result is a lane-dense [1, Mp] row, with the
            # [H,1] head as a VPU multiply + sublane reduce (no width-1 MXU matmul).
            h1 = jnp.dot(w1t_ref[...], xin_t_ref[...], preferred_element_type=f32)
            h1 = jnp.maximum(h1 + b1_ref[...], 0.0)
            nw_scr[...] = jax.nn.sigmoid(
                jnp.sum(h1 * w2_ref[...], axis=0, keepdims=True) + b2_ref[...])
            deg_scr[...] = jnp.zeros_like(deg_scr)
            he1_scr[...] = jnp.zeros_like(he1_scr)
            he2_scr[...] = jnp.zeros_like(he2_scr)

        deg_scr[...] += jnp.sum(h_f, axis=0, keepdims=True)                # B_e partial
        accumulate_he(he1_scr, er_ref[...], th1_ref)

    # ---------------- phase 1: conv1 + sigmoid, he2 accumulation ------------------
    @pl.when(phase == 1)
    def _phase1():
        @pl.when(i == 0)
        def _fold_scale():                                                 # w_e / B_e once
            deg = deg_scr[...]
            e_pos = deg > 0.0
            scale_scr[...] = jnp.where(
                e_pos,
                nw_scr[...] * pl.reciprocal(jnp.where(e_pos, deg, 1.0), approx=True),
                0.0)

        e1 = jax.nn.sigmoid(row_scaled_agg(he1_scr) + bi1_ref[...])        # conv1 + sigmoid
        # Explicitly zero lane padding (sigmoid(0)=0.5 there) so conv2 does not rely on
        # theta2's zero-padded rows.  F.dropout(training=False) -> identity.
        col = lax.broadcasted_iota(jnp.int32, e1.shape, 1)
        e1 = jnp.where(col < e1_valid_cols, e1, 0.0)
        accumulate_he(he2_scr, e1.astype(bf16), th2_ref)

    # ---------------- phase 2: conv2 + sigmoid, output stores ---------------------
    @pl.when(phase == 2)
    def _phase2():
        out = jax.nn.sigmoid(row_scaled_agg(he2_scr) + bi2_ref[...])
        o_ref[...] = out.astype(o_ref.dtype)


# ---------------------------------------------------------------------------
# Full HyperWeight.forward
# ---------------------------------------------------------------------------
def hyper_weight_forward(params, edge_index, edge_rep, x, hyper_edge, prototype,
                         node_feature=None):
    """Returns [N, hidden] bf16 (sigmoid outputs)."""
    if node_feature is not None:
        f_u = node_feature[edge_index[0]]
        f_v = node_feature[edge_index[1]]
        edge_rep = jnp.concatenate([edge_rep, (f_u + f_v) / 2.0], axis=1)

    f32, bf16 = jnp.float32, jnp.bfloat16
    N, M = edge_rep.shape[0], x.shape[0]
    hidden = params["theta2"].shape[1]
    h_lin = params["lin_w1"].shape[1]          # MLP hidden width
    feat_in = params["theta1"].shape[0]        # 2 * hidden
    e1_cols = params["theta1"].shape[1]        # conv1 output width (2 * hidden)

    P = _round_up(max(feat_in, e1_cols, hidden), 128)    # padded feature lanes
    Mp = _round_up(M, 128)
    tn = 512 if N >= 2048 else (256 if N >= 512 else 128)
    Np = _round_up(N, tn)
    n_tiles = Np // tn

    # --- glue (cheap XLA ops): ONE dense bf16 incidence, zero padding, casts ---
    ones = jnp.ones((hyper_edge.shape[1],), bf16)
    Hmat = jnp.zeros((Np, Mp), bf16).at[hyper_edge[0], hyper_edge[1]].add(ones)
    # NOTE: bf16 counts are exact up to 256 duplicate (node, hyperedge) pairs.

    def pad2(a, rows, cols, dtype):
        out = jnp.zeros((rows, cols), dtype)
        return out.at[:a.shape[0], :a.shape[1]].set(a.astype(dtype))

    xin_t = pad2(jnp.concatenate([x, prototype], axis=-1).T, P, Mp, bf16)   # [P, Mp]
    w1t = pad2(params["lin_w1"].T, h_lin, P, bf16)                          # [h_lin, P]
    b1 = params["lin_b1"].reshape(h_lin, 1).astype(f32)
    w2 = params["lin_w2"].reshape(h_lin, 1).astype(f32)
    b2 = params["lin_b2"].reshape(1, 1).astype(f32)
    er = pad2(edge_rep, Np, P, bf16)                                        # [Np, P]
    th1 = pad2(params["theta1"], P, P, bf16)
    bi1 = pad2(params["bias1"], 1, P, f32)
    th2 = pad2(params["theta2"], P, P, bf16)
    bi2 = pad2(params["bias2"], 1, P, f32)

    const2 = lambda p, i: (0, 0)
    in_specs = [
        pl.BlockSpec((P, Mp), const2),                                      # xin_t
        pl.BlockSpec((h_lin, P), const2),                                   # w1t
        pl.BlockSpec((h_lin, 1), const2),                                   # b1
        pl.BlockSpec((h_lin, 1), const2),                                   # w2
        pl.BlockSpec((1, 1), const2),                                       # b2
        pl.BlockSpec((tn, Mp), lambda p, i: (i, 0)),                        # H tile
        pl.BlockSpec((tn, P), lambda p, i: (jnp.where(p == 0, i, 0), 0)),   # edge_rep tile
        pl.BlockSpec((P, P), const2),                                       # theta1
        pl.BlockSpec((1, P), const2),                                       # bias1
        pl.BlockSpec((P, P), const2),                                       # theta2
        pl.BlockSpec((1, P), const2),                                       # bias2
    ]
    # Output tiles are only written in phase 2; in phases 0/1 the map parks on block 0,
    # which is (re)visited first in phase 2, so nothing stale ever reaches HBM.
    out_spec = pl.BlockSpec((tn, P), lambda p, i: (jnp.where(p == 2, i, 0), 0))

    scratch = [
        pltpu.VMEM((1, Mp), f32),    # nw   : node weight per hyperedge
        pltpu.VMEM((1, Mp), f32),    # B_e  : hyperedge degree
        pltpu.VMEM((1, Mp), f32),    # w/B  : folded scale
        pltpu.VMEM((Mp, P), f32),    # he1 accumulator
        pltpu.VMEM((Mp, P), f32),    # he2 accumulator
    ]

    kernel = functools.partial(_hyper_weight_kernel, e1_valid_cols=e1_cols)
    out_p = pl.pallas_call(
        kernel,
        out_shape=jax.ShapeDtypeStruct((Np, P), bf16),
        grid_spec=pltpu.PrefetchScalarGridSpec(
            num_scalar_prefetch=0,
            grid=(3, n_tiles),
            in_specs=in_specs,
            out_specs=out_spec,
            scratch_shapes=scratch),
        compiler_params=pltpu.CompilerParams(
            # N axis carries reductions into the shared he accumulators -> "arbitrary".
            dimension_semantics=("arbitrary", "arbitrary"),
            vmem_limit_bytes=_vmem_limit_bytes()),
    )(xin_t, w1t, b1, w2, b2, Hmat, er, th1, bi1, th2, bi2)
    return out_p[:N, :hidden]                  # drop row/lane padding


# ---------------------------------------------------------------------------
# Pure-JAX float32 reference (same dense HypergraphConv formulation, no bf16 emulation).
# ---------------------------------------------------------------------------
def _reference(params, edge_rep, x, hyper_edge, prototype):
    f32 = jnp.float32
    N, M = edge_rep.shape[0], x.shape[0]

    xin = jnp.concatenate([x, prototype], axis=-1)
    h = jnp.maximum(xin @ params["lin_w1"] + params["lin_b1"], 0.0)
    nw = jax.nn.sigmoid(h @ params["lin_w2"] + params["lin_b2"])            # [M, 1]
    nw_row = nw[:, 0][None, :]

    Hm = jnp.zeros((N, M), f32).at[hyper_edge[0], hyper_edge[1]].add(1.0)
    deg_e = Hm.sum(axis=0, keepdims=True)
    scale = jnp.where(deg_e > 0, nw_row / jnp.where(deg_e > 0, deg_e, 1.0), 0.0)
    dn = (Hm * nw_row).sum(axis=1, keepdims=True)
    inv_dn = jnp.where(dn > 0, 1.0 / jnp.where(dn > 0, dn, 1.0), 0.0)
    h_left = Hm * scale * inv_dn

    def conv(z, theta, bias):
        return jax.nn.sigmoid(h_left @ (Hm.T @ (z @ theta)) + bias)

    e1 = conv(edge_rep, params["theta1"], params["bias1"])
    return conv(e1, params["theta2"], params["bias2"])


# ---------------------------------------------------------------------------
def init_params(key, hidden_dim):
    H = hidden_dim
    ks = jax.random.split(key, 8)

    def glorot(k, shape):
        lim = (6.0 / (shape[0] + shape[1])) ** 0.5
        return jax.random.uniform(k, shape, jnp.float32, -lim, lim)

    return {
        "theta1": glorot(ks[0], (2 * H, 2 * H)),
        "bias1": jnp.zeros((1, 2 * H), jnp.float32),
        "theta2": glorot(ks[1], (2 * H, H)),
        "bias2": jnp.zeros((1, H), jnp.float32),
        "lin_w1": glorot(ks[2], (2 * H, H)),
        "lin_b1": 0.01 * jax.random.normal(ks[3], (1, H), jnp.float32),
        "lin_w2": glorot(ks[4], (H, 1)),
        "lin_b2": 0.01 * jax.random.normal(ks[5], (1, 1), jnp.float32),
    }


if __name__ == "__main__":
    hidden_dim = 32
    N = 16            # hypergraph nodes (== original-graph edges)
    M = 8             # hyperedges
    nnz = 24          # incidence entries

    key = jax.random.PRNGKey(0)
    kp, k1, k2, k3, k4, k5 = jax.random.split(key, 6)

    params = init_params(kp, hidden_dim)

    edge_rep = jax.random.normal(k1, (N, 2 * hidden_dim), jnp.float32)
    x = jax.random.normal(k2, (M, hidden_dim), jnp.float32)
    prototype = jax.random.normal(k3, (M, hidden_dim), jnp.float32)
    hyper_edge = jnp.stack([
        jax.random.randint(k4, (nnz,), 0, N),
        jax.random.randint(k5, (nnz,), 0, M),
    ]).astype(jnp.int32)
    edge_index = jnp.stack([jnp.arange(N, dtype=jnp.int32),
                            (jnp.arange(N, dtype=jnp.int32) + 1) % N])  # unused (node_feature=None)

    out = hyper_weight_forward(params, edge_index, edge_rep, x, hyper_edge, prototype,
                               node_feature=None)
    out = jax.block_until_ready(out)

    ref = _reference(params, edge_rep, x, hyper_edge, prototype)
    assert out.shape == (N, hidden_dim), out.shape
    assert jnp.allclose(out.astype(jnp.float32), ref, atol=2e-2, rtol=2e-2), \
        "mismatch vs pure-JAX reference"

    print("KERNEL_OK")
</pallas_src>

<mosaic_0001>
module attributes {stable_mosaic.version = 11 : i64} {
  func.func @_hyper_weight_kernel(%arg0: i32, %arg1: i32, %arg2: memref<128x128xbf16, #tpu.memory_space<vmem>>, %arg3: memref<32x128xbf16, #tpu.memory_space<vmem>>, %arg4: memref<32x1xf32, #tpu.memory_space<vmem>>, %arg5: memref<32x1xf32, #tpu.memory_space<vmem>>, %arg6: memref<1x1xf32, #tpu.memory_space<vmem>>, %arg7: memref<128x128xbf16, #tpu.memory_space<vmem>>, %arg8: memref<128x128xbf16, #tpu.memory_space<vmem>>, %arg9: memref<128x128xbf16, #tpu.memory_space<vmem>>, %arg10: memref<1x128xf32, #tpu.memory_space<vmem>>, %arg11: memref<128x128xbf16, #tpu.memory_space<vmem>>, %arg12: memref<1x128xf32, #tpu.memory_space<vmem>>, %arg13: memref<128x128xbf16, #tpu.memory_space<vmem>>, %arg14: memref<1x128xf32, #tpu.memory_space<vmem>>, %arg15: memref<1x128xf32, #tpu.memory_space<vmem>>, %arg16: memref<1x128xf32, #tpu.memory_space<vmem>>, %arg17: memref<128x128xf32, #tpu.memory_space<vmem>>, %arg18: memref<128x128xf32, #tpu.memory_space<vmem>>) attributes {dimension_semantics = [#tpu.dimension_semantics<arbitrary>, #tpu.dimension_semantics<arbitrary>], iteration_bounds = array<i64: 3, 1>, scalar_prefetch = 0 : i64, scratch_operands = 5 : i64, tpu.core_type = #tpu.core_type<tc>, window_params = [{pipeline_mode = #tpu.pipeline_mode<synchronous>, transform_indices = @transform_0, window_bounds = array<i64: 128, 128>}, {pipeline_mode = #tpu.pipeline_mode<synchronous>, transform_indices = @transform_1, window_bounds = array<i64: 32, 128>}, {pipeline_mode = #tpu.pipeline_mode<synchronous>, transform_indices = @transform_2, window_bounds = array<i64: 32, 1>}, {pipeline_mode = #tpu.pipeline_mode<synchronous>, transform_indices = @transform_3, window_bounds = array<i64: 32, 1>}, {pipeline_mode = #tpu.pipeline_mode<synchronous>, transform_indices = @transform_4, window_bounds = array<i64: 1, 1>}, {transform_indices = @transform_5, window_bounds = array<i64: 128, 128>}, {transform_indices = @transform_6, window_bounds = array<i64: 128, 128>}, {pipeline_mode = #tpu.pipeline_mode<synchronous>, transform_indices = @transform_7, window_bounds = array<i64: 128, 128>}, {pipeline_mode = #tpu.pipeline_mode<synchronous>, transform_indices = @transform_8, window_bounds = array<i64: 1, 128>}, {pipeline_mode = #tpu.pipeline_mode<synchronous>, transform_indices = @transform_9, window_bounds = array<i64: 128, 128>}, {pipeline_mode = #tpu.pipeline_mode<synchronous>, transform_indices = @transform_10, window_bounds = array<i64: 1, 128>}, {transform_indices = @transform_11, window_bounds = array<i64: 128, 128>}]} {
    %c0 = arith.constant 0 : index
    %c0_0 = arith.constant 0 : index
    %0 = vector.load %arg7[%c0, %c0_0] : memref<128x128xbf16, #tpu.memory_space<vmem>>, vector<128x128xbf16>
    %1 = arith.extf %0 : vector<128x128xbf16> to vector<128x128xf32>
    %c0_i32 = arith.constant 0 : i32
    %2 = arith.cmpi eq, %arg0, %c0_i32 : i32
    %3 = arith.extui %2 : i1 to i32
    %c0_i32_1 = arith.constant 0 : i32
    %4 = arith.cmpi ne, %3, %c0_i32_1 : i32
    scf.if %4 {
      %c0_i32_4 = arith.constant 0 : i32
      %11 = arith.cmpi eq, %arg1, %c0_i32_4 : i32
      %12 = arith.extui %11 : i1 to i32
      %c0_i32_5 = arith.constant 0 : i32
      %13 = arith.cmpi ne, %12, %c0_i32_5 : i32
      scf.if %13 {
        %c0_20 = arith.constant 0 : index
        %c0_21 = arith.constant 0 : index
        %27 = vector.load %arg3[%c0_20, %c0_21] : memref<32x128xbf16, #tpu.memory_space<vmem>>, vector<32x128xbf16>
        %c0_22 = arith.constant 0 : index
        %c0_23 = arith.constant 0 : index
        %28 = vector.load %arg2[%c0_22, %c0_23] : memref<128x128xbf16, #tpu.memory_space<vmem>>, vector<128x128xbf16>
        %cst_24 = arith.constant dense<0.000000e+00> : vector<32x128xf32>
        %29 = tpu.matmul %27, %28, %cst_24 {dimension_numbers = #tpu.dot_dimension_numbers<[1], [0], [0], [1], [0, 0, 1, 1], [], []>} : vector<32x128xbf16>, vector<128x128xbf16>, vector<32x128xf32> -> vector<32x128xf32>
        %c0_25 = arith.constant 0 : index
        %c0_26 = arith.constant 0 : index
        %30 = vector.load %arg4[%c0_25, %c0_26] : memref<32x1xf32, #tpu.memory_space<vmem>>, vector<32x1xf32>
        %31 = vector.broadcast %30 : vector<32x1xf32> to vector<32x128xf32>
        %32 = arith.addf %29, %31 : vector<32x128xf32>
        %cst_27 = arith.constant 0.000000e+00 : f32
        %33 = vector.broadcast %cst_27 : f32 to vector<32x128xf32>
        %34 = arith.maximumf %32, %33 : vector<32x128xf32>
        %c0_28 = arith.constant 0 : index
        %c0_29 = arith.constant 0 : index
        %35 = vector.load %arg5[%c0_28, %c0_29] : memref<32x1xf32, #tpu.memory_space<vmem>>, vector<32x1xf32>
        %36 = vector.broadcast %35 : vector<32x1xf32> to vector<32x128xf32>
        %37 = arith.mulf %34, %36 : vector<32x128xf32>
        %cst_30 = arith.constant dense<0.000000e+00> : vector<128xf32>
        %38 = vector.multi_reduction <add>, %37, %cst_30 [0] : vector<32x128xf32> to vector<128xf32>
        %39 = vector.shape_cast %38 : vector<128xf32> to vector<1x128xf32>
        %c0_31 = arith.constant 0 : index
        %c0_32 = arith.constant 0 : index
        %40 = vector.load %arg6[%c0_31, %c0_32] : memref<1x1xf32, #tpu.memory_space<vmem>>, vector<1x1xf32>
        %41 = vector.broadcast %40 : vector<1x1xf32> to vector<1x128xf32>
        %42 = arith.addf %39, %41 : vector<1x128xf32>
        %43 = arith.negf %42 : vector<1x128xf32>
        %44 = math.exp %43 : vector<1x128xf32>
        %cst_33 = arith.constant 1.000000e+00 : f32
        %45 = vector.broadcast %cst_33 : f32 to vector<1x128xf32>
        %46 = arith.addf %45, %44 : vector<1x128xf32>
        %47 = arith.divf %45, %46 : vector<1x128xf32>
        %c0_34 = arith.constant 0 : index
        %c0_35 = arith.constant 0 : index
        %48 = vector.load %arg14[%c0_34, %c0_35] : memref<1x128xf32, #tpu.memory_space<vmem>>, vector<1x128xf32>
        tpu.vector_store %arg14[%c0_34, %c0_35], %47 {strides = array<i32>} : memref<1x128xf32, #tpu.memory_space<vmem>>, vector<1x128xf32>,
        %cst_36 = arith.constant 0.000000e+00 : f32
        %49 = vector.broadcast %cst_36 : f32 to vector<1x128xf32>
        %c0_37 = arith.constant 0 : index
        %c0_38 = arith.constant 0 : index
        %50 = vector.load %arg15[%c0_37, %c0_38] : memref<1x128xf32, #tpu.memory_space<vmem>>, vector<1x128xf32>
        tpu.vector_store %arg15[%c0_37, %c0_38], %49 {strides = array<i32>} : memref<1x128xf32, #tpu.memory_space<vmem>>, vector<1x128xf32>,
        %cst_39 = arith.constant 0.000000e+00 : f32
        %51 = vector.broadcast %cst_39 : f32 to vector<128x128xf32>
        %c0_40 = arith.constant 0 : index
        %c0_41 = arith.constant 0 : index
        %52 = vector.load %arg17[%c0_40, %c0_41] : memref<128x128xf32, #tpu.memory_space<vmem>>, vector<128x128xf32>
        tpu.vector_store %arg17[%c0_40, %c0_41], %51 {strides = array<i32>} : memref<128x128xf32, #tpu.memory_space<vmem>>, vector<128x128xf32>,
        %cst_42 = arith.constant 0.000000e+00 : f32
        %53 = vector.broadcast %cst_42 : f32 to vector<128x128xf32>
        %c0_43 = arith.constant 0 : index
        %c0_44 = arith.constant 0 : index
        %54 = vector.load %arg18[%c0_43, %c0_44] : memref<128x128xf32, #tpu.memory_space<vmem>>, vector<128x128xf32>
        tpu.vector_store %arg18[%c0_43, %c0_44], %53 {strides = array<i32>} : memref<128x128xf32, #tpu.memory_space<vmem>>, vector<128x128xf32>,
      } else {
      }
      %c0_6 = arith.constant 0 : index
      %c0_7 = arith.constant 0 : index
      %14 = vector.load %arg15[%c0_6, %c0_7] : memref<1x128xf32, #tpu.memory_space<vmem>>, vector<1x128xf32>
      %cst = arith.constant dense<0.000000e+00> : vector<128xf32>
      %15 = vector.multi_reduction <add>, %1, %cst [0] : vector<128x128xf32> to vector<128xf32>
      %16 = vector.shape_cast %15 : vector<128xf32> to vector<1x128xf32>
      %17 = arith.addf %14, %16 : vector<1x128xf32>
      %c0_8 = arith.constant 0 : index
      %c0_9 = arith.constant 0 : index
      %18 = vector.load %arg15[%c0_8, %c0_9] : memref<1x128xf32, #tpu.memory_space<vmem>>, vector<1x128xf32>
      tpu.vector_store %arg15[%c0_8, %c0_9], %17 {strides = array<i32>} : memref<1x128xf32, #tpu.memory_space<vmem>>, vector<1x128xf32>,
      %c0_10 = arith.constant 0 : index
      %c0_11 = arith.constant 0 : index
      %19 = vector.load %arg8[%c0_10, %c0_11] : memref<128x128xbf16, #tpu.memory_space<vmem>>, vector<128x128xbf16>
      %c0_12 = arith.constant 0 : index
      %c0_13 = arith.constant 0 : index
      %20 = vector.load %arg9[%c0_12, %c0_13] : memref<128x128xbf16, #tpu.memory_space<vmem>>, vector<128x128xbf16>
      %cst_14 = arith.constant dense<0.000000e+00> : vector<128x128xf32>
      %21 = tpu.matmul %19, %20, %cst_14 {dimension_numbers = #tpu.dot_dimension_numbers<[1], [0], [0], [1], [0, 0, 1, 1], [], []>} : vector<128x128xbf16>, vector<128x128xbf16>, vector<128x128xf32> -> vector<128x128xf32>
      %c0_15 = arith.constant 0 : index
      %c0_16 = arith.constant 0 : index
      %22 = vector.load %arg17[%c0_15, %c0_16] : memref<128x128xf32, #tpu.memory_space<vmem>>, vector<128x128xf32>
      %23 = arith.truncf %21 : vector<128x128xf32> to vector<128x128xbf16>
      %cst_17 = arith.constant dense<0.000000e+00> : vector<128x128xf32>
      %24 = tpu.matmul %0, %23, %cst_17 {dimension_numbers = #tpu.dot_dimension_numbers<[0], [0], [1], [1], [0, 1, 1, 1], [], []>} : vector<128x128xbf16>, vector<128x128xbf16>, vector<128x128xf32> -> vector<128x128xf32>
      %25 = arith.addf %22, %24 : vector<128x128xf32>
      %c0_18 = arith.constant 0 : index
      %c0_19 = arith.constant 0 : index
      %26 = vector.load %arg17[%c0_18, %c0_19] : memref<128x128xf32, #tpu.memory_space<vmem>>, vector<128x128xf32>
      tpu.vector_store %arg17[%c0_18, %c0_19], %25 {strides = array<i32>} : memref<128x128xf32, #tpu.memory_space<vmem>>, vector<128x128xf32>,
    } else {
    }
    %c1_i32 = arith.constant 1 : i32
    %5 = arith.cmpi eq, %arg0, %c1_i32 : i32
    %6 = arith.extui %5 : i1 to i32
    %c0_i32_2 = arith.constant 0 : i32
    %7 = arith.cmpi ne, %6, %c0_i32_2 : i32
    scf.if %7 {
      %c0_i32_4 = arith.constant 0 : i32
      %11 = arith.cmpi eq, %arg1, %c0_i32_4 : i32
      %12 = arith.extui %11 : i1 to i32
      %c0_i32_5 = arith.constant 0 : i32
      %13 = arith.cmpi ne, %12, %c0_i32_5 : i32
      scf.if %13 {
        %c0_28 = arith.constant 0 : index
        %c0_29 = arith.constant 0 : index
        %56 = vector.load %arg15[%c0_28, %c0_29] : memref<1x128xf32, #tpu.memory_space<vmem>>, vector<1x128xf32>
        %cst_30 = arith.constant 0.000000e+00 : f32
        %57 = vector.broadcast %cst_30 : f32 to vector<1x128xf32>
        %58 = arith.cmpf ogt, %56, %57 : vector<1x128xf32>
        %c0_31 = arith.constant 0 : index
        %c0_32 = arith.constant 0 : index
        %59 = vector.load %arg14[%c0_31, %c0_32] : memref<1x128xf32, #tpu.memory_space<vmem>>, vector<1x128xf32>
        %cst_33 = arith.constant 1.000000e+00 : f32
        %60 = vector.broadcast %cst_33 : f32 to vector<1x128xf32>
        %61 = arith.select %58, %56, %60 : vector<1x128xi1>, vector<1x128xf32>
        %62 = tpu.reciprocal %61 {approx = true} : vector<1x128xf32> -> vector<1x128xf32>
        %63 = arith.mulf %59, %62 : vector<1x128xf32>
        %cst_34 = arith.constant 0.000000e+00 : f32
        %64 = vector.broadcast %cst_34 : f32 to vector<1x128xf32>
        %65 = arith.select %58, %63, %64 : vector<1x128xi1>, vector<1x128xf32>
        %c0_35 = arith.constant 0 : index
        %c0_36 = arith.constant 0 : index
        %66 = vector.load %arg16[%c0_35, %c0_36] : memref<1x128xf32, #tpu.memory_space<vmem>>, vector<1x128xf32>
        tpu.vector_store %arg16[%c0_35, %c0_36], %65 {strides = array<i32>} : memref<1x128xf32, #tpu.memory_space<vmem>>, vector<1x128xf32>,
      } else {
      }
      %c0_6 = arith.constant 0 : index
      %c0_7 = arith.constant 0 : index
      %14 = vector.load %arg14[%c0_6, %c0_7] : memref<1x128xf32, #tpu.memory_space<vmem>>, vector<1x128xf32>
      %15 = vector.broadcast %14 : vector<1x128xf32> to vector<128x128xf32>
      %16 = arith.mulf %1, %15 : vector<128x128xf32>
      %cst = arith.constant dense<0.000000e+00> : vector<128xf32>
      %17 = vector.multi_reduction <add>, %16, %cst [1] : vector<128x128xf32> to vector<128xf32>
      %18 = vector.shape_cast %17 : vector<128xf32> to vector<128x1xf32>
      %cst_8 = arith.constant 0.000000e+00 : f32
      %19 = vector.broadcast %cst_8 : f32 to vector<128x1xf32>
      %20 = arith.cmpf ogt, %18, %19 : vector<128x1xf32>
      %cst_9 = arith.constant 1.000000e+00 : f32
      %21 = vector.broadcast %cst_9 : f32 to vector<128x1xf32>
      %22 = arith.select %20, %18, %21 : vector<128x1xi1>, vector<128x1xf32>
      %23 = tpu.reciprocal %22 {approx = true} : vector<128x1xf32> -> vector<128x1xf32>
      %cst_10 = arith.constant 0.000000e+00 : f32
      %24 = vector.broadcast %cst_10 : f32 to vector<128x1xf32>
      %25 = arith.select %20, %23, %24 : vector<128x1xi1>, vector<128x1xf32>
      %c0_11 = arith.constant 0 : index
      %c0_12 = arith.constant 0 : index
      %26 = vector.load %arg16[%c0_11, %c0_12] : memref<1x128xf32, #tpu.memory_space<vmem>>, vector<1x128xf32>
      %27 = vector.broadcast %26 : vector<1x128xf32> to vector<128x128xf32>
      %28 = arith.mulf %1, %27 : vector<128x128xf32>
      %29 = arith.truncf %28 : vector<128x128xf32> to vector<128x128xbf16>
      %c0_13 = arith.constant 0 : index
      %c0_14 = arith.constant 0 : index
      %30 = vector.load %arg17[%c0_13, %c0_14] : memref<128x128xf32, #tpu.memory_space<vmem>>, vector<128x128xf32>
      %31 = arith.truncf %30 : vector<128x128xf32> to vector<128x128xbf16>
      %cst_15 = arith.constant dense<0.000000e+00> : vector<128x128xf32>
      %32 = tpu.matmul %29, %31, %cst_15 {dimension_numbers = #tpu.dot_dimension_numbers<[1], [0], [0], [1], [0, 0, 1, 1], [], []>} : vector<128x128xbf16>, vector<128x128xbf16>, vector<128x128xf32> -> vector<128x128xf32>
      %33 = vector.broadcast %25 : vector<128x1xf32> to vector<128x128xf32>
      %34 = arith.mulf %32, %33 : vector<128x128xf32>
      %c0_16 = arith.constant 0 : index
      %c0_17 = arith.constant 0 : index
      %35 = vector.load %arg10[%c0_16, %c0_17] : memref<1x128xf32, #tpu.memory_space<vmem>>, vector<1x128xf32>
      %36 = vector.broadcast %35 : vector<1x128xf32> to vector<128x128xf32>
      %37 = arith.addf %34, %36 : vector<128x128xf32>
      %38 = arith.negf %37 : vector<128x128xf32>
      %39 = math.exp %38 : vector<128x128xf32>
      %cst_18 = arith.constant 1.000000e+00 : f32
      %40 = vector.broadcast %cst_18 : f32 to vector<128x128xf32>
      %41 = arith.addf %40, %39 : vector<128x128xf32>
      %42 = arith.divf %40, %41 : vector<128x128xf32>
      %43 = tpu.iota {dimensions = array<i32: 1>} : vector<128x128xi32>
      %c64_i32 = arith.constant 64 : i32
      %44 = vector.broadcast %c64_i32 : i32 to vector<128x128xi32>
      %45 = arith.cmpi slt, %43, %44 : vector<128x128xi32>
      %cst_19 = arith.constant 0.000000e+00 : f32
      %46 = vector.broadcast %cst_19 : f32 to vector<128x128xf32>
      %47 = arith.select %45, %42, %46 : vector<128x128xi1>, vector<128x128xf32>
      %48 = arith.truncf %47 : vector<128x128xf32> to vector<128x128xbf16>
      %c0_20 = arith.constant 0 : index
      %c0_21 = arith.constant 0 : index
      %49 = vector.load %arg11[%c0_20, %c0_21] : memref<128x128xbf16, #tpu.memory_space<vmem>>, vector<128x128xbf16>
      %cst_22 = arith.constant dense<0.000000e+00> : vector<128x128xf32>
      %50 = tpu.matmul %48, %49, %cst_22 {dimension_numbers = #tpu.dot_dimension_numbers<[1], [0], [0], [1], [0, 0, 1, 1], [], []>} : vector<128x128xbf16>, vector<128x128xbf16>, vector<128x128xf32> -> vector<128x128xf32>
      %c0_23 = arith.constant 0 : index
      %c0_24 = arith.constant 0 : index
      %51 = vector.load %arg18[%c0_23, %c0_24] : memref<128x128xf32, #tpu.memory_space<vmem>>, vector<128x128xf32>
      %52 = arith.truncf %50 : vector<128x128xf32> to vector<128x128xbf16>
      %cst_25 = arith.constant dense<0.000000e+00> : vector<128x128xf32>
      %53 = tpu.matmul %0, %52, %cst_25 {dimension_numbers = #tpu.dot_dimension_numbers<[0], [0], [1], [1], [0, 1, 1, 1], [], []>} : vector<128x128xbf16>, vector<128x128xbf16>, vector<128x128xf32> -> vector<128x128xf32>
      %54 = arith.addf %51, %53 : vector<128x128xf32>
      %c0_26 = arith.constant 0 : index
      %c0_27 = arith.constant 0 : index
      %55 = vector.load %arg18[%c0_26, %c0_27] : memref<128x128xf32, #tpu.memory_space<vmem>>, vector<128x128xf32>
      tpu.vector_store %arg18[%c0_26, %c0_27], %54 {strides = array<i32>} : memref<128x128xf32, #tpu.memory_space<vmem>>, vector<128x128xf32>,
    } else {
    }
    %c2_i32 = arith.constant 2 : i32
    %8 = arith.cmpi eq, %arg0, %c2_i32 : i32
    %9 = arith.extui %8 : i1 to i32
    %c0_i32_3 = arith.constant 0 : i32
    %10 = arith.cmpi ne, %9, %c0_i32_3 : i32
    scf.if %10 {
      %c0_4 = arith.constant 0 : index
      %c0_5 = arith.constant 0 : index
      %11 = vector.load %arg14[%c0_4, %c0_5] : memref<1x128xf32, #tpu.memory_space<vmem>>, vector<1x128xf32>
      %12 = vector.broadcast %11 : vector<1x128xf32> to vector<128x128xf32>
      %13 = arith.mulf %1, %12 : vector<128x128xf32>
      %cst = arith.constant dense<0.000000e+00> : vector<128xf32>
      %14 = vector.multi_reduction <add>, %13, %cst [1] : vector<128x128xf32> to vector<128xf32>
      %15 = vector.shape_cast %14 : vector<128xf32> to vector<128x1xf32>
      %cst_6 = arith.constant 0.000000e+00 : f32
      %16 = vector.broadcast %cst_6 : f32 to vector<128x1xf32>
      %17 = arith.cmpf ogt, %15, %16 : vector<128x1xf32>
      %cst_7 = arith.constant 1.000000e+00 : f32
      %18 = vector.broadcast %cst_7 : f32 to vector<128x1xf32>
      %19 = arith.select %17, %15, %18 : vector<128x1xi1>, vector<128x1xf32>
      %20 = tpu.reciprocal %19 {approx = true} : vector<128x1xf32> -> vector<128x1xf32>
      %cst_8 = arith.constant 0.000000e+00 : f32
      %21 = vector.broadcast %cst_8 : f32 to vector<128x1xf32>
      %22 = arith.select %17, %20, %21 : vector<128x1xi1>, vector<128x1xf32>
      %c0_9 = arith.constant 0 : index
      %c0_10 = arith.constant 0 : index
      %23 = vector.load %arg16[%c0_9, %c0_10] : memref<1x128xf32, #tpu.memory_space<vmem>>, vector<1x128xf32>
      %24 = vector.broadcast %23 : vector<1x128xf32> to vector<128x128xf32>
      %25 = arith.mulf %1, %24 : vector<128x128xf32>
      %26 = arith.truncf %25 : vector<128x128xf32> to vector<128x128xbf16>
      %c0_11 = arith.constant 0 : index
      %c0_12 = arith.constant 0 : index
      %27 = vector.load %arg18[%c0_11, %c0_12] : memref<128x128xf32, #tpu.memory_space<vmem>>, vector<128x128xf32>
      %28 = arith.truncf %27 : vector<128x128xf32> to vector<128x128xbf16>
      %cst_13 = arith.constant dense<0.000000e+00> : vector<128x128xf32>
      %29 = tpu.matmul %26, %28, %cst_13 {dimension_numbers = #tpu.dot_dimension_numbers<[1], [0], [0], [1], [0, 0, 1, 1], [], []>} : vector<128x128xbf16>, vector<128x128xbf16>, vector<128x128xf32> -> vector<128x128xf32>
      %30 = vector.broadcast %22 : vector<128x1xf32> to vector<128x128xf32>
      %31 = arith.mulf %29, %30 : vector<128x128xf32>
      %c0_14 = arith.constant 0 : index
      %c0_15 = arith.constant 0 : index
      %32 = vector.load %arg12[%c0_14, %c0_15] : memref<1x128xf32, #tpu.memory_space<vmem>>, vector<1x128xf32>
      %33 = vector.broadcast %32 : vector<1x128xf32> to vector<128x128xf32>
      %34 = arith.addf %31, %33 : vector<128x128xf32>
      %35 = arith.negf %34 : vector<128x128xf32>
      %36 = math.exp %35 : vector<128x128xf32>
      %cst_16 = arith.constant 1.000000e+00 : f32
      %37 = vector.broadcast %cst_16 : f32 to vector<128x128xf32>
      %38 = arith.addf %37, %36 : vector<128x128xf32>
      %39 = arith.divf %37, %38 : vector<128x128xf32>
      %40 = arith.truncf %39 : vector<128x128xf32> to vector<128x128xbf16>
      %c0_17 = arith.constant 0 : index
      %c0_18 = arith.constant 0 : index
      %41 = vector.load %arg13[%c0_17, %c0_18] : memref<128x128xbf16, #tpu.memory_space<vmem>>, vector<128x128xbf16>
      tpu.vector_store %arg13[%c0_17, %c0_18], %40 {strides = array<i32>} : memref<128x128xbf16, #tpu.memory_space<vmem>>, vector<128x128xbf16>,
    } else {
    }
    return
  }
  func.func @transform_0(%arg0: i32, %arg1: i32) -> (i32, i32) {
    %c0_i32 = arith.constant 0 : i32
    %c0_i32_0 = arith.constant 0 : i32
    %c0_i32_1 = arith.constant 0 : i32
    return %c0_i32, %c0_i32_0 : i32, i32
  }
  func.func @transform_1(%arg0: i32, %arg1: i32) -> (i32, i32) {
    %c0_i32 = arith.constant 0 : i32
    %c0_i32_0 = arith.constant 0 : i32
    %c0_i32_1 = arith.constant 0 : i32
    return %c0_i32, %c0_i32_0 : i32, i32
  }
  func.func @transform_2(%arg0: i32, %arg1: i32) -> (i32, i32) {
    %c0_i32 = arith.constant 0 : i32
    %c0_i32_0 = arith.constant 0 : i32
    %c0_i32_1 = arith.constant 0 : i32
    return %c0_i32, %c0_i32_0 : i32, i32
  }
  func.func @transform_3(%arg0: i32, %arg1: i32) -> (i32, i32) {
    %c0_i32 = arith.constant 0 : i32
    %c0_i32_0 = arith.constant 0 : i32
    %c0_i32_1 = arith.constant 0 : i32
    return %c0_i32, %c0_i32_0 : i32, i32
  }
  func.func @transform_4(%arg0: i32, %arg1: i32) -> (i32, i32) {
    %c0_i32 = arith.constant 0 : i32
    %c0_i32_0 = arith.constant 0 : i32
    %c0_i32_1 = arith.constant 0 : i32
    return %c0_i32, %c0_i32_0 : i32, i32
  }
  func.func @transform_5(%arg0: i32, %arg1: i32) -> (i32, i32) {
    %c0_i32 = arith.constant 0 : i32
    %c0_i32_0 = arith.constant 0 : i32
    return %arg1, %c0_i32 : i32, i32
  }
  func.func @transform_6(%arg0: i32, %arg1: i32) -> (i32, i32) {
    %c0_i32 = arith.constant 0 : i32
    %0 = arith.cmpi eq, %arg0, %c0_i32 : i32
    %c0_i32_0 = arith.constant 0 : i32
    %1 = arith.select %0, %arg1, %c0_i32_0 : i32
    %c0_i32_1 = arith.constant 0 : i32
    %c0_i32_2 = arith.constant 0 : i32
    return %1, %c0_i32_1 : i32, i32
  }
  func.func @transform_7(%arg0: i32, %arg1: i32) -> (i32, i32) {
    %c0_i32 = arith.constant 0 : i32
    %c0_i32_0 = arith.constant 0 : i32
    %c0_i32_1 = arith.constant 0 : i32
    return %c0_i32, %c0_i32_0 : i32, i32
  }
  func.func @transform_8(%arg0: i32, %arg1: i32) -> (i32, i32) {
    %c0_i32 = arith.constant 0 : i32
    %c0_i32_0 = arith.constant 0 : i32
    %c0_i32_1 = arith.constant 0 : i32
    return %c0_i32, %c0_i32_0 : i32, i32
  }
  func.func @transform_9(%arg0: i32, %arg1: i32) -> (i32, i32) {
    %c0_i32 = arith.constant 0 : i32
    %c0_i32_0 = arith.constant 0 : i32
    %c0_i32_1 = arith.constant 0 : i32
    return %c0_i32, %c0_i32_0 : i32, i32
  }
  func.func @transform_10(%arg0: i32, %arg1: i32) -> (i32, i32) {
    %c0_i32 = arith.constant 0 : i32
    %c0_i32_0 = arith.constant 0 : i32
    %c0_i32_1 = arith.constant 0 : i32
    return %c0_i32, %c0_i32_0 : i32, i32
  }
  func.func @transform_11(%arg0: i32, %arg1: i32) -> (i32, i32) {
    %c2_i32 = arith.constant 2 : i32
    %0 = arith.cmpi eq, %arg0, %c2_i32 : i32
    %c0_i32 = arith.constant 0 : i32
    %1 = arith.select %0, %arg1, %c0_i32 : i32
    %c0_i32_0 = arith.constant 0 : i32
    %c0_i32_1 = arith.constant 0 : i32
    return %1, %c0_i32_0 : i32, i32
  }
}

</mosaic_0001>

<bundles_post_ra>
// kernel: tpu_custom_call.1
= control target key start
LH: loop header
LB: loop body
LE: loop exit
PB: predicated region body
PF: predicated region fallthrough
CT: control target
= control target key end

     0   :  { %s4723_s0 = inlined_call_operand.vmem [shape: bf16[128,128], index: 0, kind: input, shape index: {}]   ;;  %s4724_s1 = inlined_call_operand.hbm [shape: bf16[32,128], index: 1, kind: input, shape index: {}]   ;;  %s4725_s2 = inlined_call_operand.vmem [shape: f32[32,1], index: 2, kind: input, shape index: {}]   ;;  %s4726_s3 = inlined_call_operand.vmem [shape: f32[32,1], index: 3, kind: input, shape index: {}]   ;;  %s4727_s4 = inlined_call_operand.<no memory space> [shape: f32[1,1], index: 4, kind: input, shape index: {}]   ;;  %s4728_s5 = inlined_call_operand.hbm [shape: bf16[128,128], index: 5, kind: input, shape index: {}]   ;;  %s4729_s6 = inlined_call_operand.hbm [shape: bf16[128,128], index: 6, kind: input, shape index: {}]   ;;  %s4730_s7 = inlined_call_operand.hbm [shape: bf16[128,128], index: 7, kind: input, shape index: {}]   ;;  %s4731_s8 = inlined_call_operand.vmem [shape: f32[1,128], index: 8, kind: input, shape index: {}]   ;;  %s4732_s9 = inlined_call_operand.hbm [shape: bf16[128,128], index: 9, kind: input, shape index: {}]   ;;  %s4733_s10 = inlined_call_operand.vmem [shape: f32[1,128], index: 10, kind: input, shape index: {}]   ;;  %s4734_s11 = inlined_call_operand.hbm [shape: bf16[128,128], index: 11, kind: output, shape index: {}]  }
   0x1   :  { %4739 = sst [smem:[#allocation26_spill]] %s4734_s11  ;;  %v16_v0 = vstv %s4727_s4 }
   0x2   :  { %17 = vst [vmem:[#allocation7] sm:$0x1] %v16_v0 }
   0x3   :  { %18 = vsyncpa [#allocation9], 0 }
   0x4   :  { %19 = vsyncpa [#allocation12], 0 }
   0x5   :  { %20 = vsyncpa [#allocation16], 0 }
   0x6   :  { %21 = vsyncpa [#allocation10], 0 }
   0x7   :  { %23 = vsyncpa [#allocation10 + $0x1], 0  ;;  %s3904_s19 = smov 0   ;;  %s3906_s20 = smov 0  }
   0x8   :  { %s3908_s21 = smov 0  }
   0x9 LB: > { %4740 = sst [smem:[#allocation24_spill]] %s3823_s20  ;;  %s3920_s4 = sadd.s32 4294967295, %s3827_s21   ;;  %s3827_s21 = sphi %s3908_s21, %s29_s21   ;;  %s3823_s20 = sphi %s3906_s20, %s4764_s20   ;;  %s3819_s19 = sphi %s3904_s19, %s4763_s19  }
   0xa   : > { %s41_s23 = sadd.s32 1, %s3823_s20  ;;  %p2708_p0 = scmp.ge.s32.totalorder %s3827_s21, 1 }
   0xb   : > { %p43_p1 = scmp.ge.s32.totalorder %s41_s23, 3  ;;  %p321_p2 = scmp.lt.s32.totalorder %s3827_s21, 4 }
   0xc   : > { %p4735_p3 = scmp.eq.s32.totalorder %s3920_s4, 0  ;;  %s3829_s25 = smov [#allocation8]  }
   0xd   : > { %s4766_s23 = smov (%p43_p1, %s41_s23), 0  ;;  %p3929_p4 = pnand %p2708_p0, %p321_p2 }
   0xe   : > { %4741 = sst [smem:[#allocation25_spill]] %s4766_s23  ;;  %s336_s26 = sshll.u32 %s3829_s25, 4  ;;  %s337_s26 = int_to_ptr.vmem [resolvable:$true] %s336_s26 }
   0xf   : > { %s4742_s24 = scalar_select %p3929_p4, 1, 0 }
  0x10   : > { %p3310_p5 = pneg %p3929_p4  ;;  %s3830_s28 = smov [#allocation11]  }
  0x11   : > { %s361_s29 = sshll.u32 %s3830_s28, 4  ;;  %s3615_s13 = scalar_lea.hbm %s4724_s1, 256  ;;  %s362_s29 = int_to_ptr.vmem [resolvable:$true] %s361_s29 }
  0x12   : > { %p3937_p6 = pnand %p4735_p3, %p3310_p5  ;;  %p3616_p7 = scmp.ne.s32.totalorder %s4724_s1, %s3615_s13 }
  0x13   : > { %p3622_p11 = scmp.lt.u32.totalorder %s3615_s13, %s4724_s1 }
  0x14   : > { %p3949_p8 = pneg %p3937_p6 }
  0x16   : > { %p3618_p9 = pnand %p3949_p8, %p3616_p7 }
  0x18   : > { %p3619_p10 = pneg %p3618_p9 }
  0x1a   : > { %p3624_p12 = pnand %p3622_p11, %p3619_p10 }
  0x1c   : > { %3627 = shalt.err (!%p3624_p12)
}
  0x1d   : > { %s3628_s25 = scalar_lea.vmem %s337_s26, 256  ;;  %p3636_p2 = scmp.lt.s32.totalorder %s337_s26, %s337_s26 }
  0x1e   : > { %p3629_p13 = scmp.ne.s32.totalorder %s337_s26, %s3628_s25  ;;  %p3637_p5 = scmp.lt.s32.totalorder %s3628_s25, %s3628_s25 }
  0x20   : > { %p3631_p0 = pnand %p3629_p13, %p3949_p8  ;;  %p3638_p3 = por %p3637_p5, %p3636_p2 }
  0x22   : > { %p3632_p1 = pneg %p3631_p0 }
  0x24   : > { %p3639_p4 = pnand %p3638_p3, %p3632_p1 }
  0x26   : > { %3642 = shalt.err (!%p3639_p4)
}
  0x27   : > { %s3831_s28 = smov 64   ;;  %s3832_s30 = smov 4  }
  0x28   : > { %3313 = dma.hbm_to_vmem [thread:$0]  (!%p3937_p6), %s4724_s1, 256, %s337_s26, [#allocation9], %s3831_s28, %s3831_s28, %s3832_s30  }
  0x29   : > { %s3833_s14 = smov [#allocation14]   ;;  %s3643_s25 = scalar_lea.hbm %s4728_s5, 1024 }
  0x2a   : > { %s374_s15 = sshll.u32 %s3833_s14, 4  ;;  %p3644_p3 = scmp.ne.s32.totalorder %s4728_s5, %s3643_s25  ;;  %s375_s15 = int_to_ptr.vmem [resolvable:$true] %s374_s15 }
  0x2b   : > { %p3650_p9 = scmp.lt.u32.totalorder %s3643_s25, %s4728_s5 }
  0x2c   : > { %p3646_p4 = pnand %p3644_p3, %p3949_p8 }
  0x2e   : > { %p3647_p7 = pneg %p3646_p4 }
  0x30   : > { %p3652_p10 = pnand %p3650_p9, %p3647_p7 }
  0x32   : > { %3655 = shalt.err (!%p3652_p10)
}
  0x33   : > { %s3656_s26 = scalar_lea.vmem %s362_s29, 1024  ;;  %p3664_p0 = scmp.lt.s32.totalorder %s362_s29, %s362_s29 }
  0x34   : > { %p3657_p11 = scmp.ne.s32.totalorder %s362_s29, %s3656_s26  ;;  %p3665_p1 = scmp.lt.s32.totalorder %s3656_s26, %s3656_s26 }
  0x36   : > { %p3659_p12 = pnand %p3657_p11, %p3949_p8  ;;  %p3666_p2 = por %p3665_p1, %p3664_p0 }
  0x38   : > { %p3660_p13 = pneg %p3659_p12 }
  0x3a   : > { %p3667_p5 = pnand %p3666_p2, %p3660_p13 }
  0x3c   : > { %3670 = shalt.err (!%p3667_p5)
}
  0x3d   : > { %3316 = dma.hbm_to_vmem [thread:$0]  (!%p3937_p6), %s4728_s5, 1024, %s362_s29, [#allocation12], %s3831_s28, %s3831_s28, %s3832_s30  }
  0x3e   : > { %s3671_s12 = scalar_lea.hbm %s4730_s7, 1024 }
  0x3f   : > { %p3672_p3 = scmp.ne.s32.totalorder %s4730_s7, %s3671_s12  ;;  %p3678_p9 = scmp.lt.u32.totalorder %s3671_s12, %s4730_s7 }
  0x41   : > { %p3674_p4 = pnand %p3672_p3, %p3949_p8 }
  0x43   : > { %p3675_p7 = pneg %p3674_p4 }
  0x45   : > { %p3680_p10 = pnand %p3678_p9, %p3675_p7 }
  0x47   : > { %3683 = shalt.err (!%p3680_p10)
}
  0x48   : > { %s3684_s25 = scalar_lea.vmem %s375_s15, 1024  ;;  %p3692_p0 = scmp.lt.s32.totalorder %s375_s15, %s375_s15 }
  0x49   : > { %p3685_p11 = scmp.ne.s32.totalorder %s375_s15, %s3684_s25  ;;  %p3693_p1 = scmp.lt.s32.totalorder %s3684_s25, %s3684_s25 }
  0x4b   : > { %p3687_p12 = pnand %p3685_p11, %p3949_p8  ;;  %p3694_p2 = por %p3693_p1, %p3692_p0 }
  0x4d   : > { %p3688_p13 = pneg %p3687_p12 }
  0x4f   : > { %p3695_p5 = pnand %p3694_p2, %p3688_p13 }
  0x51   : > { %3698 = shalt.err (!%p3695_p5)
}
  0x52   : > { %3319 = dma.hbm_to_vmem [thread:$0]  (!%p3937_p6), %s4730_s7, 1024, %s375_s15, [#allocation12], %s3831_s28, %s3831_s28, %s3832_s30  }
  0x53   : > { %s3834_s11 = smov [#allocation15]   ;;  %s3699_s12 = scalar_lea.hbm %s4732_s9, 1024 }
  0x54   : > { %s390_s20 = sshll.u32 %s3834_s11, 4  ;;  %p3700_p7 = scmp.ne.s32.totalorder %s4732_s9, %s3699_s12  ;;  %s391_s20 = int_to_ptr.vmem [resolvable:$true] %s390_s20 }
  0x55   : > { %p3706_p11 = scmp.lt.u32.totalorder %s3699_s12, %s4732_s9 }
  0x56   : > { %p3702_p9 = pnand %p3700_p7, %p3949_p8 }
  0x58   : > { %p3703_p10 = pneg %p3702_p9 }
  0x5a   : > { %p3708_p12 = pnand %p3706_p11, %p3703_p10 }
  0x5c   : > { %3711 = shalt.err (!%p3708_p12)
}
  0x5d   : > { %s3712_s15 = scalar_lea.vmem %s391_s20, 1024  ;;  %p3720_p2 = scmp.lt.s32.totalorder %s391_s20, %s391_s20 }
  0x5e   : > { %p3713_p13 = scmp.ne.s32.totalorder %s391_s20, %s3712_s15  ;;  %p3721_p5 = scmp.lt.s32.totalorder %s3712_s15, %s3712_s15 }
  0x60   : > { %p3715_p0 = pnand %p3713_p13, %p3949_p8  ;;  %p3722_p4 = por %p3721_p5, %p3720_p2 }
  0x62   : > { %p3716_p1 = pneg %p3715_p0 }
  0x64   : > { %p3723_p3 = pnand %p3722_p4, %p3716_p1 }
  0x66   : > { %3726 = shalt.err (!%p3723_p3)
}
  0x67   : > { %3322 = dma.hbm_to_vmem [thread:$0]  (!%p3937_p6), %s4732_s9, 1024, %s391_s20, [#allocation16], %s3831_s28, %s3831_s28, %s3832_s30  }
  0x68   : > { %s407_s16 = sand.u32 1, %s3827_s21   ;;  %s3835_s26 = smov [#allocation13]  }
  0x69   : > { %s420_s11 = sshll.u32 %s3835_s26, 4  ;;  %p4745_p8 = scmp.lt.s32.totalorder %s3827_s21, 3  ;;  %s421_s11 = int_to_ptr.vmem [resolvable:$true] %s420_s11 }
  0x6a   : > { %p4746_p7 = scmp.eq.s32.totalorder %s3827_s21, 0  ;;  %s408_s27 = scalar_lea.sflag [#allocation9], %s407_s16 }
  0x6b   : > { %s3727_s13 = scalar_lea.hbm %s4729_s6, 1024 }
  0x6c   : > { %p4038_p4 = pnand %p4746_p7, %p4745_p8  ;;  %p3728_p6 = scmp.ne.s32.totalorder %s4729_s6, %s3727_s13 }
  0x6d   : > { %p3734_p11 = scmp.lt.u32.totalorder %s3727_s13, %s4729_s6 }
  0x6e   : > { %p3729_p3 = pneg %p4038_p4 }
  0x70   : > { %p3730_p9 = pnand %p3729_p3, %p3728_p6 }
  0x72   : > { %p3731_p10 = pneg %p3730_p9 }
  0x74   : > { %p3736_p12 = pnand %p3734_p11, %p3731_p10 }
  0x76   : > { %3739 = shalt.err (!%p3736_p12)
}
  0x77   : > { %s3740_s15 = scalar_lea.vmem %s421_s11, 1024  ;;  %s3747_s25 = scalar_lea.vmem %s421_s11, 2048 }
  0x78   : > { %p3741_p13 = scmp.ne.s32.totalorder %s421_s11, %s3740_s15  ;;  %p3748_p2 = scmp.lt.s32.totalorder %s421_s11, %s421_s11 }
  0x79   : > { %p3749_p5 = scmp.lt.s32.totalorder %s3747_s25, %s3740_s15 }
  0x7a   : > { %p3743_p0 = pnand %p3741_p13, %p3729_p3 }
  0x7b   : > { %p3750_p8 = por %p3749_p5, %p3748_p2 }
  0x7c   : > { %p3744_p1 = pneg %p3743_p0 }
  0x7e   : > { %p3751_p7 = pnand %p3750_p8, %p3744_p1 }
  0x80   : > { %3754 = shalt.err (!%p3751_p7)
}
  0x81   : > { %3326 = dma.hbm_to_vmem [thread:$0]  (!%p4038_p4), %s4729_s6, 1024, %s421_s11, %s408_s27, %s3831_s28, %s3831_s28, %s3832_s30  }
  0x82   : > { %p4748_p6 = scmp.ne.s32.totalorder %s4742_s24, 0 }
  0x83   : > { %p4749_p3 = scmp.eq.s32.totalorder (!%p4748_p6), %s3920_s4, 0 }
  0x84   : > { %432 = sbr.rel (%p4748_p6) target bundleno = 1763 (0x6e3), region = 64 }
  0x8b   : > { %3794 = dma.done.wait (%p4749_p3), [#allocation9], 256   ;;  %p4750_p9 = pmov %p4749_p3 }
  0x8c   : > { %p4751_p10 = pmov %p4749_p3 }
  0x8d   : > { %3796 = vsyncadd (%p4750_p9), [#allocation9], 4294967040 }
  0x8e   : > { %3798 = dma.done.wait (%p4751_p10), [#allocation12], 1024   ;;  %p4752_p11 = pmov %p4749_p3 }
  0x8f   : > { %s442_s26 = sand.u32 1, %s3920_s4   ;;  %p4753_p4 = pmov %p4749_p3 }
  0x90   : > { %3800 = vsyncadd (%p4752_p11), [#allocation12], 4294966272  ;;  %s443_s22 = scalar_lea.sflag [#allocation9], %s442_s26 }
  0x91   : > { %3802 = dma.done.wait (%p4753_p4), %s443_s22, 1024   ;;  %p4754_p12 = pmov %p4749_p3 }
  0x92   : > { %p4755_p13 = pmov %p4749_p3 }
  0x93   : > { %3804 = vsyncadd (%p4754_p12), %s443_s22, 4294966272 }
  0x94   : > { %3806 = dma.done.wait (%p4755_p13), [#allocation12], 1024   ;;  %p4756_p0 = pmov %p4749_p3 }
  0x96   : > { %3808 = vsyncadd (%p4756_p0), [#allocation12], 4294966272  ;;  %p4757_p1 = pmov %p4756_p0 }
  0x97   : > { %p4758_p2 = pmov %p4756_p0 }
  0x98   : > { %3810 = dma.done.wait (%p4757_p1), [#allocation16], 1024  }
  0x99   : > { %3812 = vsyncadd (%p4758_p2), [#allocation16], 4294966272  ;;  %v4084_v1 = vld [vmem:[#allocation11] sm:$0xf]  ;;  %v4086_v2 = vld [vmem:[#allocation11 + $0x4] sm:$0xf] }
  0x9a   : > { %v4088_v3 = vld [vmem:[#allocation11 + $0x8] sm:$0xf]  ;;  %v4090_v4 = vld [vmem:[#allocation11 + $0xc] sm:$0xf]  ;;  %v4092_v5 = vld [vmem:[#allocation11 + $0x10] sm:$0xf]  ;;  %v4097_v7 = vunpack.c.l.bf16 %v4084_v1  ;;  %v4100_v8 = vunpack.c.l.bf16 %v4086_v2 }
  0x9b   : > { %v4094_v6 = vld [vmem:[#allocation11 + $0x14] sm:$0xf]  ;;  %v4103_v9 = vunpack.c.l.bf16 %v4088_v3  ;;  %v4105_v10 = vld [vmem:[#allocation11 + $0x18] sm:$0xf]  ;;  %v4107_v11 = vld [vmem:[#allocation11 + $0x1c] sm:$0xf]  ;;  %v4112_v13 = vunpack.c.l.bf16 %v4090_v4  ;;  %v4115_v14 = vunpack.c.l.bf16 %v4092_v5 }
  0x9c   : > { %v4109_v12 = vld [vmem:[#allocation11 + $0x20] sm:$0xf]  ;;  %v4118_v15 = vunpack.c.l.bf16 %v4094_v6  ;;  %v4120_v16 = vld [vmem:[#allocation11 + $0x24] sm:$0xf]  ;;  %v4122_v17 = vld [vmem:[#allocation11 + $0x28] sm:$0xf]  ;;  %v4127_v19 = vunpack.c.l.bf16 %v4105_v10  ;;  %v4130_v20 = vunpack.c.l.bf16 %v4107_v11 }
  0x9d   : > { %v4124_v18 = vld [vmem:[#allocation11 + $0x2c] sm:$0xf]  ;;  %v4133_v21 = vunpack.c.l.bf16 %v4109_v12  ;;  %v4135_v22 = vld [vmem:[#allocation11 + $0x30] sm:$0xf]  ;;  %v4137_v23 = vld [vmem:[#allocation11 + $0x34] sm:$0xf]  ;;  %v4142_v25 = vunpack.c.l.bf16 %v4120_v16  ;;  %v4145_v26 = vunpack.c.l.bf16 %v4122_v17 }
  0x9e   : > { %v4139_v24 = vld [vmem:[#allocation11 + $0x38] sm:$0xf]  ;;  %v4148_v27 = vunpack.c.l.bf16 %v4124_v18  ;;  %v4150_v28 = vld [vmem:[#allocation11 + $0x3c] sm:$0xf]  ;;  %v4153_v29 = vunpack.c.l.bf16 %v4135_v22  ;;  %v4156_v30 = vunpack.c.l.bf16 %v4137_v23  ;;  %p2721_p5 = scmp.ne.s32.totalorder %s3819_s19, 0 }
  0x9f   : > { %v4159_v31 = vunpack.c.l.bf16 %v4139_v24  ;;  %v4162_v32 = vunpack.c.l.bf16 %v4150_v28  ;;  %v3383_v33 = vld [vmem:[#allocation14] sm:$0xff] (!%p2721_p5)   ;;  %v2749_v34 = vcombine.low (!%p2721_p5), %v4084_v1, %v4086_v2  ;;  %v3384_v35 = vld [vmem:[#allocation14 + $0x8] sm:$0xff] (!%p2721_p5)   ;;  %v2750_v36 = vcombine.low (!%p2721_p5), %v4088_v3, %v4090_v4  ;;  %v3385_v37 = vld [vmem:[#allocation14 + $0x10] sm:$0xff] (!%p2721_p5)  }
  0xa0   : > { %536 = sbr.rel (%p2721_p5) target bundleno = 665 (0x299), region = 88  ;;  %3046 = vmatprep.subr.bf16.mxu1 (!%p2721_p5), %v3383_v33  ;;  %v2751_v38 = vcombine.low (!%p2721_p5), %v4092_v5, %v4094_v6  ;;  %v3386_v39 = vld [vmem:[#allocation14 + $0x18] sm:$0xff] (!%p2721_p5)   ;;  %v3391_v40 = vld [vmem:[#allocation13] sm:$0xff] (!%p2721_p5)   ;;  %v2752_v41 = vcombine.low (!%p2721_p5), %v4105_v10, %v4107_v11  ;;  %v2753_v43 = vcombine.low (!%p2721_p5), %v4109_v12, %v4120_v16  ;;  %v3388_v44 = vld [vmem:[#allocation14 + $0x28] sm:$0xff] (!%p2721_p5)   ;;  %v2754_v47 = vcombine.low (!%p2721_p5), %v4122_v17, %v4124_v18 }
  0xa1   : > { %1107 = vxpose.xlu0.c.b16.start [1/8] (!%p2721_p5), %v2749_v34, 128  ;;  %3047 = vmatpush3.bf16.msra.mxu1 (!%p2721_p5), %v3383_v33  ;;  %v3387_v42 = vld [vmem:[#allocation14 + $0x20] sm:$0xff] (!%p2721_p5)   ;;  %v3399_v45 = vld [vmem:[%s4723_s0] sm:$0xff] (!%p2721_p5)   ;;  %v3400_v46 = vld [vmem:[%s4723_s0 + $0x8] sm:$0xff] (!%p2721_p5)   ;;  %v2755_v51 = vcombine.low (!%p2721_p5), %v4135_v22, %v4137_v23  ;;  %v2756_v54 = vcombine.low (!%p2721_p5), %v4139_v24, %v4150_v28 }
  0xa2   : > { %3048 = vmatprep.subr.bf16.mxu1 (!%p2721_p5), %v3384_v35  ;;  %3062 = vmatprep.mubr.bf16.mxu1 (!%p2721_p5), %v3391_v40  ;;  %v3389_v48 = vld [vmem:[#allocation14 + $0x30] sm:$0xff] (!%p2721_p5)   ;;  %v3401_v49 = vld [vmem:[%s4723_s0 + $0x10] sm:$0xff] (!%p2721_p5)   ;;  %v3402_v52 = vld [vmem:[%s4723_s0 + $0x18] sm:$0xff] (!%p2721_p5)   ;;  %v3836_v40 = vmov (!%p2721_p5), 0  }
  0xa3   : > { %3026 = vmatprep.subr.bf16.mxu0 (!%p2721_p5), %v3399_v45  ;;  %v3390_v50 = vld [vmem:[#allocation14 + $0x38] sm:$0xff] (!%p2721_p5)   ;;  %v3407_v53 = vld [vmem:[#allocation8] sm:$0xff] (!%p2721_p5)   ;;  %v3392_v56 = vld [vmem:[#allocation13 + $0x8] sm:$0xff] (!%p2721_p5)   ;;  %3381 = vset.pattern.permute.xlu1 (!%p2721_p5), %v3836_v40 }
  0xa4   : > { %3027 = vmatpush3.bf16.msra.mxu0 (!%p2721_p5), %v3399_v45  ;;  %3042 = vmatprep.mubr.bf16.mxu0 (!%p2721_p5), %v3407_v53  ;;  %v3403_v55 = vld [vmem:[%s4723_s0 + $0x20] sm:$0xff] (!%p2721_p5)   ;;  %v3404_v58 = vld [vmem:[%s4723_s0 + $0x28] sm:$0xff] (!%p2721_p5)   ;;  %v3405_v59 = vld [vmem:[%s4723_s0 + $0x30] sm:$0xff] (!%p2721_p5)  }
  0xa5   : > { %1108 = vxpose.xlu0.c.b16.cont [2/8] (!%p2721_p5), %v2750_v36, 128  ;;  %3049 = vmatpush3.bf16.msra.mxu1 (!%p2721_p5), %v3384_v35  ;;  %v3393_v57 = vld [vmem:[#allocation13 + $0x10] sm:$0xff] (!%p2721_p5)   ;;  %v3394_v60 = vld [vmem:[#allocation13 + $0x18] sm:$0xff] (!%p2721_p5)   ;;  %v3395_v61 = vld [vmem:[#allocation13 + $0x20] sm:$0xff] (!%p2721_p5)  }
  0xa6   : > { %3050 = vmatprep.subr.bf16.mxu1 (!%p2721_p5), %v3385_v37  ;;  %3028 = vmatprep.subr.bf16.mxu0 (!%p2721_p5), %v3400_v46  ;;  %v3406_v62 = vld [vmem:[%s4723_s0 + $0x38] sm:$0xff] (!%p2721_p5)   ;;  %v3408_v0 = vld [vmem:[#allocation8 + $0x8] sm:$0xff] (!%p2721_p5)   ;;  %v3397_v33 = vld [vmem:[#allocation13 + $0x30] sm:$0xff] (!%p2721_p5)  }
  0xa7   : > { %v3396_v63 = vld [vmem:[#allocation13 + $0x28] sm:$0xff]   ;;  %v3398_v34 = vld [vmem:[#allocation13 + $0x38] sm:$0xff]  }
  0xa8   : > { %3029 = vmatpush3.bf16.msra.mxu0 %v3400_v46  ;;  %v563_v46 = vld [vmem:[%s4725_s2 + $0x10] sm:$0xff]  ;;  %v735_v53 = vld [vmem:[#allocation7] sm:$0x1] }
  0xa9   : > { %1109 = vxpose.xlu0.c.b16.cont [3/8] %v2751_v38, 128  ;;  %3051 = vmatpush3.bf16.msra.mxu1 %v3385_v37  ;;  %v787_v38 = vadd.f32 %v4100_v8, %v4097_v7 }
  0xaa   : > { %3052 = vmatprep.subr.bf16.mxu1 %v3386_v39  ;;  %3030 = vmatprep.subr.bf16.mxu0 %v3401_v49 }
  0xac   : > { %3031 = vmatpush3.bf16.msra.mxu0 %v3401_v49 }
  0xad   : > { %1110 = vxpose.xlu0.c.b16.cont [4/8] %v2752_v41, 128  ;;  %3053 = vmatpush3.bf16.msra.mxu1 %v3386_v39  ;;  %v561_v41 = vld [vmem:[%s4725_s2] sm:$0xff] }
  0xae   : > { %3054 = vmatprep.subr.bf16.mxu1 %v3387_v42  ;;  %3032 = vmatprep.subr.bf16.mxu0 %v3402_v52 }
  0xaf   : > { %567 = vperm.xlu1 %3381, %v561_v41   ;;  %v3837_v41 = vmov 0.0  }
  0xb0   : > { %3033 = vmatpush3.bf16.msra.mxu0 %v3402_v52  ;;  %v699_v52 = vld [vmem:[%s4726_s3 + $0x8] sm:$0xff]  ;;  %753 = vst [vmem:[#allocation3] sm:$0x1] %v3837_v41  ;;  %770 = vst [vmem:[#allocation6] sm:$0xff] %v3837_v41 }
  0xb1   : > { %1111 = vxpose.xlu0.c.b16.cont [5/8] %v2753_v43, 128  ;;  %3055 = vmatpush3.bf16.msra.mxu1 %v3387_v42  ;;  %v788_v42 = vadd.f32 %v787_v38, %v4103_v9  ;;  %771 = vst [vmem:[#allocation6 + $0x8] sm:$0xff] %v3837_v41  ;;  %772 = vst [vmem:[#allocation6 + $0x10] sm:$0xff] %v3837_v41 }
  0xb2   : > { %3056 = vmatprep.subr.bf16.mxu1 %v3388_v44  ;;  %3034 = vmatprep.subr.bf16.mxu0 %v3403_v55  ;;  %773 = vst [vmem:[#allocation6 + $0x18] sm:$0xff] %v3837_v41  ;;  %774 = vst [vmem:[#allocation6 + $0x20] sm:$0xff] %v3837_v41 }
  0xb3   : > { %v789_v45 = vadd.f32 %v788_v42, %v4112_v13  ;;  %775 = vst [vmem:[#allocation6 + $0x28] sm:$0xff] %v3837_v41  ;;  %776 = vst [vmem:[#allocation6 + $0x30] sm:$0xff] %v3837_v41 }
  0xb4   : > { %3035 = vmatpush3.bf16.msra.mxu0 %v3403_v55  ;;  %v700_v55 = vld [vmem:[%s4726_s3 + $0x10] sm:$0xff]  ;;  %777 = vst [vmem:[#allocation6 + $0x38] sm:$0xff] %v3837_v41  ;;  %778 = vst [vmem:[#allocation6 + $0x40] sm:$0xff] %v3837_v41 }
  0xb5   : > { %1112 = vxpose.xlu0.c.b16.cont [6/8] %v2754_v47, 128  ;;  %3057 = vmatpush3.bf16.msra.mxu1 %v3388_v44  ;;  %v562_v44 = vld [vmem:[%s4725_s2 + $0x8] sm:$0xff]  ;;  %v790_v47 = vadd.f32 %v789_v45, %v4115_v14  ;;  %779 = vst [vmem:[#allocation6 + $0x48] sm:$0xff] %v3837_v41  ;;  %780 = vst [vmem:[#allocation6 + $0x50] sm:$0xff] %v3837_v41 }
  0xb6   : > { %3058 = vmatprep.subr.bf16.mxu1 %v3389_v48  ;;  %3036 = vmatprep.subr.bf16.mxu0 %v3404_v58  ;;  %781 = vst [vmem:[#allocation6 + $0x58] sm:$0xff] %v3837_v41  ;;  %782 = vst [vmem:[#allocation6 + $0x60] sm:$0xff] %v3837_v41 }
  0xb7   : > { %572 = vperm.xlu1 %3381, %v562_v44   ;;  %v791_v49 = vadd.f32 %v790_v47, %v4118_v15  ;;  %783 = vst [vmem:[#allocation6 + $0x68] sm:$0xff] %v3837_v41  ;;  %784 = vst [vmem:[#allocation6 + $0x70] sm:$0xff] %v3837_v41 }
  0xb8   : > { %3037 = vmatpush3.bf16.msra.mxu0 %v3404_v58  ;;  %785 = vst [vmem:[#allocation6 + $0x78] sm:$0xff] %v3837_v41 }
  0xb9   : > { %1113 = vxpose.xlu0.c.b16.cont [7/8] %v2755_v51, 128  ;;  %3059 = vmatpush3.bf16.msra.mxu1 %v3389_v48  ;;  %v564_v48 = vld [vmem:[%s4725_s2 + $0x18] sm:$0xff]  ;;  %v792_v51 = vadd.f32 %v791_v49, %v4127_v19 }
  0xba   : > { %3060 = vmatprep.subr.bf16.mxu1 %v3390_v50  ;;  %3038 = vmatprep.subr.bf16.mxu0 %v3405_v59 }
  0xbb   : > { %577 = vperm.xlu1 %3381, %v563_v46  }
  0xbc   : > { %3039 = vmatpush3.bf16.msra.mxu0 %v3405_v59 }
  0xbd   : > { %1114 = vxpose.xlu0.c.b16.end [8/8] %v2756_v54, 128  ;;  %3061 = vmatpush3.bf16.msra.mxu1 %v3390_v50  ;;  %v698_v50 = vld [vmem:[%s4726_s3] sm:$0xff]  ;;  %v793_v54 = vadd.f32 %v792_v51, %v4130_v20 }
  0xbe   : > { %3040 = vmatprep.subr.bf16.mxu0 %v3406_v62 }
  0xbf   : > { %582 = vperm.xlu1 %3381, %v564_v48  }
  0xc0   : > { %3063 = vmatmul.mubr.bf16.vlgmr.msra.gmra.mrb[0].mxu1 %v3392_v56  ;;  %3041 = vmatpush3.bf16.msra.mxu0 %v3406_v62  ;;  %v794_v56 = vadd.f32 %v793_v54, %v4133_v21 }
  0xc1   : > { %3066 = vmatprep.mubr.bf16.mxu1 %v3393_v57  ;;  %v701_v57 = vld [vmem:[%s4726_s3 + $0x18] sm:$0xff] }
  0xc2   : > { %v795_v58 = vadd.f32 %v794_v56, %v4142_v25 }
  0xc3   : > { %3043 = vmatmul.mubr.bf16.vlgmr.msra.gmra.mrb[0].mxu0 %v3408_v0  ;;  %704 = vperm.xlu1 %3381, %v698_v50  }
  0xc4   : > { %v796_v59 = vadd.f32 %v795_v58, %v4145_v26 }
  0xc6   : > { %3382 = vset.pattern.permute.xlu0 %v3836_v40 }
  0xc7   : > { %738 = vperm.xlu0 %3382, %v735_v53   ;;  %709 = vperm.xlu1 %3381, %v699_v52  }
  0xc8   : > { %3067 = vmatmul.mubr.bf16.gmra.mrb[4].mxu1 %v3394_v60  ;;  %v797_v60 = vadd.f32 %v796_v59, %v4148_v27 }
  0xc9   : > { %3070 = vmatprep.mubr.bf16.mxu1 %v3395_v61 }
  0xca   : > { %v798_v61 = vadd.f32 %v797_v60, %v4153_v29 }
  0xcb   : > { %714 = vperm.xlu1 %3381, %v700_v55  }
  0xcc   : > { %v799_v62 = vadd.f32 %v798_v61, %v4156_v30 }
  0xcf   : > { %719 = vperm.xlu1 %3381, %v701_v57  }
  0xd0   : > { %3071 = vmatmul.mubr.bf16.gmra.mrb[8].mxu1 %v3396_v63  ;;  %v800_v63 = vadd.f32 %v799_v62, %v4159_v31 }
  0xd1   : > { %3074 = vmatprep.mubr.bf16.mxu1 %v3397_v33 }
  0xd2   : > { %v801_v0 = vadd.f32 %v800_v63, %v4162_v32 }
  0xd4   : > { %v802_v33 = vrot.slane %v801_v0, 4 }
  0xd8   : > { %3075 = vmatmul.mubr.bf16.gmra.mrb[12].mxu1 %v3398_v34  ;;  %v803_v34 = vadd.f32 %v802_v33, %v801_v0 }
 0x107   : > { %v1115_v35 = vpop.trf.xlu0 }
 0x108   : > { %3094 = vmatprep.mubr.bf16.mxu0 %v1115_v35  ;;  %v804_v35 = vrot.slane %v803_v34, 2 }
 0x10a   : > { %v805_v38 = vadd.f32 %v804_v35, %v803_v34 }
 0x10b   : > { %v4205_v36 = vpop.trf.xlu0 }
 0x10c   : > { %v806_v40 = vrot.slane %v805_v38, 1 }
 0x10e   : > { %v807_v42 = vadd.f32 %v806_v40, %v805_v38 }
 0x10f   : > { %v4207_v37 = vpop.trf.xlu0 }
 0x113   : > { %v4211_v39 = vpop.trf.xlu0 }
 0x117   : > { %v1119_v43 = vpop.trf.xlu0 }
 0x118   : > { %3102 = vmatprep.mubr.bf16.mxu1 %v1119_v43  ;;  %v786_v43 = vld [vmem:[#allocation3] sm:$0x1] }
 0x119   : > { %v808_v44 = vadd.f32 %v807_v42, %v786_v43 }
 0x11b   : > { %809 = vst [vmem:[#allocation3] sm:$0x1] %v808_v44 }
 0x12e   : > { %v568_v44 = vpop.permute.xlu1 %567 }
 0x193   : > { %v3064_v45 = vpop.f32.mrb[0].mxu1 }
 0x194   : > { %v972_v46 = vpop.f32.mrb[1].mxu1 }
 0x195   : > { %v3065_v47 = vpop.f32.mrb[2].mxu1 }
 0x196   : > { %v1052_v48 = vpack.c.bf16 %v3065_v47, %v3064_v45  ;;  %v975_v49 = vpop.f32.mrb[3].mxu1  ;;  %v3044_v58 = vpop.f32.mrb[0].mxu0 }
 0x197   : > { %v1051_v50 = vpack.c.bf16 %v975_v49, %v972_v46  ;;  %v679_v60 = vpop.f32.mrb[1].mxu0  ;;  %v1120_v45 = vpop.trf.xlu0 }
 0x198   : > { %v3045_v62 = vpop.f32.mrb[2].mxu0  ;;  %v573_v46 = vpop.permute.xlu1 %572  ;;  %v680_v49 = vadd.f32 %v679_v60, %v568_v44 }
 0x199   : > { %3078 = vmatprep.subr.bf16.mxu0 %v1051_v50  ;;  %3238 = vmatprep.subr.bf16.mxu1 %v1051_v50  ;;  %v682_v33 = vpop.f32.mrb[3].mxu0 }
 0x19a   : > { %3079 = vmatpush3.bf16.msra.mxu0 %v1051_v50  ;;  %3246 = vmatpush3.bf16.msra.mxu1 %v1051_v50 }
 0x19b   : > { %v3068_v51 = vpop.f32.mrb[4].mxu1  ;;  %3080 = vmatprep.subr.bf16.mxu0 %v1052_v48  ;;  %3239 = vmatprep.subr.bf16.mxu1 %v1052_v48  ;;  %v1121_v47 = vpop.trf.xlu0 }
 0x19c   : > { %v988_v52 = vpop.f32.mrb[5].mxu1 }
 0x19d   : > { %v3069_v53 = vpop.f32.mrb[6].mxu1 }
 0x19e   : > { %v1054_v54 = vpack.c.bf16 %v3069_v53, %v3068_v51  ;;  %v991_v55 = vpop.f32.mrb[7].mxu1  ;;  %3081 = vmatpush3.bf16.msra.mxu0 %v1052_v48  ;;  %3247 = vmatpush3.bf16.msra.mxu1 %v1052_v48  ;;  %v578_v48 = vpop.permute.xlu1 %577  ;;  %v683_v51 = vadd.f32 %v682_v33, %v573_v46  ;;  %v694_v53 = vmax.f32 %v680_v49, 0.0 }
 0x19f   : > { %v1053_v56 = vpack.c.bf16 %v991_v55, %v988_v52  ;;  %v1122_v52 = vpop.trf.xlu0  ;;  %v688_v55 = vadd.f32 %v3044_v58, %v578_v48 }
 0x1a1   : > { %3082 = vmatprep.subr.bf16.mxu0 %v1053_v56  ;;  %3240 = vmatprep.subr.bf16.mxu1 %v1053_v56 }
 0x1a2   : > { %3083 = vmatpush3.bf16.msra.mxu0 %v1053_v56  ;;  %3248 = vmatpush3.bf16.msra.mxu1 %v1053_v56  ;;  %v583_v50 = vpop.permute.xlu1 %582  ;;  %v695_v56 = vmax.f32 %v683_v51, 0.0 }
 0x1a3   : > { %v3072_v57 = vpop.f32.mrb[8].mxu1  ;;  %3084 = vmatprep.subr.bf16.mxu0 %v1054_v54  ;;  %3241 = vmatprep.subr.bf16.mxu1 %v1054_v54 }
 0x1a4   : > { %v1004_v59 = vpop.f32.mrb[9].mxu1 }
 0x1a5   : > { %v3073_v61 = vpop.f32.mrb[10].mxu1 }
 0x1a6   : > { %v1056_v63 = vpack.c.bf16 %v3073_v61, %v3072_v57  ;;  %v1007_v0 = vpop.f32.mrb[11].mxu1  ;;  %3085 = vmatpush3.bf16.msra.mxu0 %v1054_v54  ;;  %3249 = vmatpush3.bf16.msra.mxu1 %v1054_v54  ;;  %v705_v54 = vpop.permute.xlu1 %704  ;;  %v696_v61 = vmax.f32 %v688_v55, 0.0 }
 0x1a7   : > { %v1055_v34 = vpack.c.bf16 %v1007_v0, %v1004_v59  ;;  %v722_v57 = vmul.f32 %v705_v54, %v694_v53 }
 0x1a9   : > { %3086 = vmatprep.subr.bf16.mxu0 %v1055_v34  ;;  %3242 = vmatprep.subr.bf16.mxu1 %v1055_v34 }
 0x1aa   : > { %3087 = vmatpush3.bf16.msra.mxu0 %v1055_v34  ;;  %3250 = vmatpush3.bf16.msra.mxu1 %v1055_v34  ;;  %v710_v59 = vpop.permute.xlu1 %709 }
 0x1ab   : > { %v3076_v35 = vpop.f32.mrb[12].mxu1  ;;  %3088 = vmatprep.subr.bf16.mxu0 %v1056_v63  ;;  %3243 = vmatprep.subr.bf16.mxu1 %v1056_v63  ;;  %v723_v0 = vmul.f32 %v710_v59, %v695_v56 }
 0x1ac   : > { %v1020_v38 = vpop.f32.mrb[13].mxu1 }
 0x1ad   : > { %v3077_v40 = vpop.f32.mrb[14].mxu1 }
 0x1ae   : > { %v1058_v41 = vpack.c.bf16 %v3077_v40, %v3076_v35  ;;  %v1023_v42 = vpop.f32.mrb[15].mxu1  ;;  %3089 = vmatpush3.bf16.msra.mxu0 %v1056_v63  ;;  %3251 = vmatpush3.bf16.msra.mxu1 %v1056_v63  ;;  %v691_v63 = vadd.f32 %v3045_v62, %v583_v50  ;;  %v715_v34 = vpop.permute.xlu1 %714  ;;  %v741_v40 = vlaneseq }
 0x1af   : > { %v1057_v43 = vpack.c.bf16 %v1023_v42, %v1020_v38  ;;  %v724_v35 = vmul.f32 %v715_v34, %v696_v61 }
 0x1b0   : > { %v742_v58 = vshrl.u32 %v741_v40, 7 }
 0x1b1   : > { %3244 = vmatprep.subr.bf16.mxu1 %v1057_v43  ;;  %3090 = vmatprep.subr.bf16.mxu0 %v1057_v43 }
 0x1b2   : > { %3091 = vmatpush3.bf16.msra.mxu0 %v1057_v43  ;;  %3252 = vmatpush3.bf16.msra.mxu1 %v1057_v43  ;;  %v720_v38 = vpop.permute.xlu1 %719 }
 0x1b3   : > { %3092 = vmatprep.subr.bf16.mxu0 %v1058_v41  ;;  %3245 = vmatprep.subr.bf16.mxu1 %v1058_v41 }
 0x1b6   : > { %3093 = vmatpush3.bf16.msra.mxu0 %v1058_v41  ;;  %3253 = vmatpush3.bf16.msra.mxu1 %v1058_v41 }
 0x1b9   : > { %3103 = vmatmul.mubr.bf16.vlgmr.msra.gmra.mrb[16].mxu1 %v1120_v45  ;;  %3095 = vmatmul.mubr.bf16.vlgmr.msra.gmra.mrb[4].mxu0 %v4205_v36  ;;  %v726_v36 = vadd.f32 %v723_v0, %v722_v57  ;;  %v743_v45 = vsub.s32 0, %v742_v58 }
 0x1ba   : > { %3098 = vmatprep.mubr.bf16.mxu0 %v4207_v37  ;;  %3106 = vmatprep.mubr.bf16.mxu1 %v1121_v47  ;;  %v697_v37 = vmax.f32 %v691_v63, 0.0 }
 0x1bb   : > { %v727_v60 = vadd.f32 %v726_v36, %v724_v35 }
 0x1bc   : > { %v725_v33 = vmul.f32 %v720_v38, %v697_v37 }
 0x1be   : > { %v728_v41 = vadd.f32 %v727_v60, %v725_v33 }
 0x1c0   : > { %v729_v42 = vrot.slane %v728_v41, 4 }
 0x1c1   : > { %3107 = vmatmul.mubr.bf16.gmra.mrb[20].mxu1 %v1122_v52  ;;  %3099 = vmatmul.mubr.bf16.gmra.mrb[8].mxu0 %v4211_v39  ;;  %v739_v39 = vpop.permute.xlu0 %738 }
 0x1c2   : > { %v730_v43 = vadd.f32 %v729_v42, %v728_v41  ;;  %v744_v48 = vrot.slane %v739_v39, %v743_v45 }
 0x1c4   : > { %v731_v44 = vrot.slane %v730_v43, 2 }
 0x1c6   : > { %v732_v46 = vadd.f32 %v731_v44, %v730_v43 }
 0x1c8   : > { %v733_v47 = vrot.slane %v732_v46, 1 }
 0x1ca   : > { %v734_v62 = vadd.f32 %v733_v47, %v732_v46 }
 0x1cc   : > { %v745_v49 = vadd.f32 %v744_v48, %v734_v62 }
 0x1ce   : > { %v2732_v50 = vmul.f32 -1.442695, %v745_v49 }
 0x1d0   : > { %3409 = vpow2.f32 %v2732_v50 }
 0x1da   : > { %v3410_v51 = vpop.eup %3409 }
 0x1db   : > { %v749_v52 = vadd.f32 1.0, %v3410_v51 }
 0x1dd   : > { %3411 = vrcp.f32 %v749_v52 }
 0x1e7   : > { %v3412_v53 = vpop.eup %3411 }
 0x1e8   : > { %752 = vst [vmem:[#allocation2] sm:$0x1] %v3412_v53 }
 0x28c   : > { %v3096_v54 = vpop.f32.mrb[4].mxu0  ;;  %v3104_v55 = vpop.f32.mrb[16].mxu1 }
 0x28d   : > { %v1157_v56 = vpop.f32.mrb[5].mxu0  ;;  %v1189_v57 = vpop.f32.mrb[17].mxu1  ;;  %1238 = vst [vmem:[#allocation5 + $0x10] sm:$0xff] %v3096_v54  ;;  %1246 = vst [vmem:[#allocation5 + $0x50] sm:$0xff] %v3104_v55 }
 0x28e   : > { %v3097_v59 = vpop.f32.mrb[6].mxu0  ;;  %v3105_v61 = vpop.f32.mrb[18].mxu1  ;;  %1236 = vst [vmem:[#allocation5] sm:$0xff] %v1157_v56  ;;  %1244 = vst [vmem:[#allocation5 + $0x40] sm:$0xff] %v1189_v57 }
 0x28f   : > { %v1160_v63 = vpop.f32.mrb[7].mxu0  ;;  %v1192_v0 = vpop.f32.mrb[19].mxu1  ;;  %1239 = vst [vmem:[#allocation5 + $0x18] sm:$0xff] %v3097_v59  ;;  %1247 = vst [vmem:[#allocation5 + $0x58] sm:$0xff] %v3105_v61 }
 0x290   : > { %1237 = vst [vmem:[#allocation5 + $0x8] sm:$0xff] %v1160_v63  ;;  %1245 = vst [vmem:[#allocation5 + $0x48] sm:$0xff] %v1192_v0 }
 0x294   : > { %v3100_v36 = vpop.f32.mrb[8].mxu0  ;;  %v3108_v34 = vpop.f32.mrb[20].mxu1 }
 0x295   : > { %v1173_v37 = vpop.f32.mrb[9].mxu0  ;;  %v1205_v35 = vpop.f32.mrb[21].mxu1  ;;  %1242 = vst [vmem:[#allocation5 + $0x30] sm:$0xff] %v3100_v36  ;;  %1250 = vst [vmem:[#allocation5 + $0x70] sm:$0xff] %v3108_v34 }
 0x296   : > { %v3101_v60 = vpop.f32.mrb[10].mxu0  ;;  %v3109_v38 = vpop.f32.mrb[22].mxu1  ;;  %1240 = vst [vmem:[#allocation5 + $0x20] sm:$0xff] %v1173_v37  ;;  %1248 = vst [vmem:[#allocation5 + $0x60] sm:$0xff] %v1205_v35 }
 0x297   : > { %v1176_v33 = vpop.f32.mrb[11].mxu0  ;;  %v1208_v40 = vpop.f32.mrb[23].mxu1  ;;  %1243 = vst [vmem:[#allocation5 + $0x38] sm:$0xff] %v3101_v60  ;;  %1251 = vst [vmem:[#allocation5 + $0x78] sm:$0xff] %v3109_v38 }
 0x298   : > { %1241 = vst [vmem:[#allocation5 + $0x28] sm:$0xff] %v1176_v33  ;;  %1249 = vst [vmem:[#allocation5 + $0x68] sm:$0xff] %v1208_v40 }
 0x299 PF: > { %p2757_p8 = scmp.ne.s32.totalorder %s3819_s19, 1 }
 0x29a   : > { %v1418_v41 = vld [vmem:[#allocation5] sm:$0xff] (!%p2757_p8)  ;;  %v1419_v42 = vld [vmem:[#allocation5 + $0x8] sm:$0xff] (!%p2757_p8)  ;;  %v1420_v58 = vld [vmem:[#allocation5 + $0x10] sm:$0xff] (!%p2757_p8) }
 0x29b   : > { %1255 = sbr.rel (%p2757_p8) target bundleno = 1425 (0x591), region = 96  ;;  %v1434_v43 = vpack.c.bf16 (!%p2757_p8), %v1419_v42, %v1418_v41  ;;  %v1421_v44 = vld [vmem:[#allocation5 + $0x18] sm:$0xff] (!%p2757_p8)  ;;  %v1426_v54 = vld [vmem:[#allocation5 + $0x40] sm:$0xff] (!%p2757_p8)  ;;  %v1427_v55 = vld [vmem:[#allocation5 + $0x48] sm:$0xff] (!%p2757_p8) }
 0x29c   : > { %v1435_v45 = vpack.c.bf16 (!%p2757_p8), %v1421_v44, %v1420_v58  ;;  %v1424_v48 = vld [vmem:[#allocation5 + $0x30] sm:$0xff] (!%p2757_p8)  ;;  %v1260_v62 = vld [vmem:[#allocation3] sm:$0x1] (!%p2757_p8)  ;;  %v4255_v50 = vld [vmem:[#allocation2] ss:$0 sm:$0xff] (!%p2757_p8)  ;;  %v1438_v61 = vpack.c.bf16 (!%p2757_p8), %v1427_v55, %v1426_v54 }
 0x29d   : > { %v1422_v39 = vld [vmem:[#allocation5 + $0x20] sm:$0xff] (!%p2757_p8)  ;;  %3110 = vmatprep.subr.bf16.mxu0 (!%p2757_p8), %v1434_v43  ;;  %vm1261_vm0 = vcmp.gt.f32.partialorder (!%p2757_p8), %v1260_v62, 0.0  ;;  %v1275_v52 = vmul.f32 (!%p2757_p8), %v4255_v50, %v4097_v7  ;;  %v1277_v53 = vmul.f32 (!%p2757_p8), %v4255_v50, %v4103_v9  ;;  %v1276_v57 = vmul.f32 (!%p2757_p8), %v4255_v50, %v4100_v8  ;;  %v1428_v0 = vld [vmem:[#allocation5 + $0x50] sm:$0xff] (!%p2757_p8)  ;;  %v1429_v36 = vld [vmem:[#allocation5 + $0x58] sm:$0xff] (!%p2757_p8) }
 0x29e   : > { %3111 = vmatpush3.bf16.msra.mxu0 (!%p2757_p8), %v1434_v43  ;;  %v1425_v49 = vld [vmem:[#allocation5 + $0x38] sm:$0xff] (!%p2757_p8)  ;;  %v1263_v51 = vsel (!%p2757_p8), %vm1261_vm0, %v1260_v62, 1.0  ;;  %v1278_v59 = vmul.f32 (!%p2757_p8), %v4255_v50, %v4112_v13  ;;  %v1279_v63 = vmul.f32 (!%p2757_p8), %v4255_v50, %v4115_v14  ;;  %v1280_v34 = vmul.f32 (!%p2757_p8), %v4255_v50, %v4118_v15  ;;  %v1430_v33 = vld [vmem:[#allocation5 + $0x60] sm:$0xff] (!%p2757_p8) }
 0x29f   : > { %v1423_v46 = vld [vmem:[#allocation5 + $0x28] sm:$0xff] (!%p2757_p8)  ;;  %3112 = vmatprep.subr.bf16.mxu0 (!%p2757_p8), %v1435_v45  ;;  %3421 = vrcp.f32 (!%p2757_p8), %v1263_v51  ;;  %v1437_v56 = vpack.c.bf16 (!%p2757_p8), %v1425_v49, %v1424_v48  ;;  %1291 = vadd.xlane.f32.xlu0 (!%p2757_p8), %v1275_v52  ;;  %v1262_v37 = vld [vmem:[#allocation2] sm:$0x1] (!%p2757_p8)  ;;  %v1439_v35 = vpack.c.bf16 (!%p2757_p8), %v1429_v36, %v1428_v0  ;;  %v1281_v60 = vmul.f32 (!%p2757_p8), %v4255_v50, %v4127_v19 }
 0x2a0   : > { %v1436_v47 = vpack.c.bf16 (!%p2757_p8), %v1423_v46, %v1422_v39  ;;  %1295 = vadd.xlane.f32.xlu1 (!%p2757_p8), %v1277_v53  ;;  %v1431_v40 = vld [vmem:[#allocation5 + $0x68] sm:$0xff] (!%p2757_p8)  ;;  %v1282_v41 = vmul.f32 (!%p2757_p8), %v4255_v50, %v4130_v20  ;;  %v1283_v44 = vmul.f32 (!%p2757_p8), %v4255_v50, %v4133_v21  ;;  %v1433_v39 = vld [vmem:[#allocation5 + $0x78] sm:$0xff] (!%p2757_p8)  ;;  %v1284_v46 = vmul.f32 (!%p2757_p8), %v4255_v50, %v4142_v25 }
 0x2a1   : > { %v1440_v58 = vpack.c.bf16 (!%p2757_p8), %v1431_v40, %v1430_v33  ;;  %v1285_v48 = vmul.f32 (!%p2757_p8), %v4255_v50, %v4145_v26  ;;  %v1286_v62 = vmul.f32 (!%p2757_p8), %v4255_v50, %v4148_v27  ;;  %v1287_v51 = vmul.f32 (!%p2757_p8), %v4255_v50, %v4153_v29 }
 0x2a2   : > { %3113 = vmatpush3.bf16.msra.mxu0 %v1435_v45  ;;  %v1432_v45 = vld [vmem:[#allocation5 + $0x70] sm:$0xff]  ;;  %v1289_v36 = vmul.f32 %v4255_v50, %v4159_v31 }
 0x2a3   : > { %3114 = vmatprep.subr.bf16.mxu0 %v1436_v47  ;;  %1293 = vadd.xlane.f32.xlu0 %v1276_v57 }
 0x2a4   : > { %1297 = vadd.xlane.f32.xlu1 %v1278_v59  ;;  %v1288_v59 = vmul.f32 %v4255_v50, %v4156_v30 }
 0x2a6   : > { %3115 = vmatpush3.bf16.msra.mxu0 %v1436_v47  ;;  %v1441_v47 = vpack.c.bf16 %v1433_v39, %v1432_v45 }
 0x2a7   : > { %3116 = vmatprep.subr.bf16.mxu0 %v1437_v56  ;;  %1299 = vadd.xlane.f32.xlu0 %v1279_v63 }
 0x2a8   : > { %1301 = vadd.xlane.f32.xlu1 %v1280_v34 }
 0x2a9   : > { %v3422_v38 = vpop.eup %3421 }
 0x2aa   : > { %3117 = vmatpush3.bf16.msra.mxu0 %v1437_v56  ;;  %v1265_v42 = vmul.f32 %v3422_v38, %v1262_v37 }
 0x2ab   : > { %3118 = vmatprep.subr.bf16.mxu0 %v1438_v61  ;;  %1303 = vadd.xlane.f32.xlu0 %v1281_v60 }
 0x2ac   : > { %v1266_v43 = vsel %vm1261_vm0, %v1265_v42, 0.0  ;;  %1305 = vadd.xlane.f32.xlu1 %v1282_v41 }
 0x2ad   : > { %1267 = vst [vmem:[#allocation4] sm:$0x1] %v1266_v43 }
 0x2ae   : > { %3119 = vmatpush3.bf16.msra.mxu0 %v1438_v61 }
 0x2af   : > { %3120 = vmatprep.subr.bf16.mxu0 %v1439_v35  ;;  %1307 = vadd.xlane.f32.xlu0 %v1283_v44 }
 0x2b0   : > { %1309 = vadd.xlane.f32.xlu1 %v1284_v46 }
 0x2b2   : > { %3121 = vmatpush3.bf16.msra.mxu0 %v1439_v35  ;;  %v1290_v35 = vmul.f32 %v4255_v50, %v4162_v32 }
 0x2b3   : > { %3122 = vmatprep.subr.bf16.mxu0 %v1440_v58  ;;  %1311 = vadd.xlane.f32.xlu0 %v1285_v48  ;;  %v3414_v48 = vld [vmem:[#allocation15 + $0x8] sm:$0xff]  }
 0x2b4   : > { %v2759_v49 = vld [vmem:[#allocation4] ss:$0 sm:$0xff]  ;;  %1313 = vadd.xlane.f32.xlu1 %v1286_v62  ;;  %v3415_v62 = vld [vmem:[#allocation15 + $0x10] sm:$0xff]  }
 0x2b5   : > { %v1394_v52 = vmul.f32 %v2759_v49, %v4097_v7  ;;  %v1395_v53 = vmul.f32 %v2759_v49, %v4100_v8  ;;  %v1396_v54 = vmul.f32 %v2759_v49, %v4103_v9  ;;  %v1397_v55 = vmul.f32 %v2759_v49, %v4112_v13 }
 0x2b6   : > { %3123 = vmatpush3.bf16.msra.mxu0 %v1440_v58  ;;  %v1398_v56 = vmul.f32 %v2759_v49, %v4115_v14  ;;  %v1399_v57 = vmul.f32 %v2759_v49, %v4118_v15  ;;  %v1400_v34 = vmul.f32 %v2759_v49, %v4127_v19  ;;  %v1401_v37 = vmul.f32 %v2759_v49, %v4130_v20 }
 0x2b7   : > { %3124 = vmatprep.subr.bf16.mxu0 %v1441_v47  ;;  %v1410_v61 = vpack.c.bf16 %v1395_v53, %v1394_v52  ;;  %v1411_v63 = vpack.c.bf16 %v1397_v55, %v1396_v54  ;;  %1315 = vadd.xlane.f32.xlu0 %v1287_v51  ;;  %v1402_v60 = vmul.f32 %v2759_v49, %v4133_v21  ;;  %v3416_v51 = vld [vmem:[#allocation15 + $0x18] sm:$0xff]   ;;  %v3417_v52 = vld [vmem:[#allocation15 + $0x20] sm:$0xff]   ;;  %v3418_v53 = vld [vmem:[#allocation15 + $0x28] sm:$0xff]  }
 0x2b8   : > { %v1412_v0 = vpack.c.bf16 %v1399_v57, %v1398_v56  ;;  %1317 = vadd.xlane.f32.xlu1 %v1288_v59  ;;  %v1403_v38 = vmul.f32 %v2759_v49, %v4142_v25  ;;  %v1413_v33 = vpack.c.bf16 %v1401_v37, %v1400_v34  ;;  %v1404_v41 = vmul.f32 %v2759_v49, %v4145_v26  ;;  %v3420_v54 = vld [vmem:[#allocation15 + $0x38] sm:$0xff]  }
 0x2b9   : > { %3126 = vmatprep.mubr.bf16.mxu0 %v1410_v61  ;;  %v1405_v42 = vmul.f32 %v2759_v49, %v4148_v27  ;;  %v1406_v58 = vmul.f32 %v2759_v49, %v4153_v29  ;;  %v1407_v43 = vmul.f32 %v2759_v49, %v4156_v30  ;;  %v1408_v45 = vmul.f32 %v2759_v49, %v4159_v31 }
 0x2ba   : > { %3125 = vmatpush3.bf16.msra.mxu0 %v1441_v47  ;;  %v1414_v40 = vpack.c.bf16 %v1403_v38, %v1402_v60  ;;  %v1409_v39 = vmul.f32 %v2759_v49, %v4162_v32  ;;  %v3413_v47 = vld [vmem:[#allocation15] sm:$0xff]   ;;  %v3419_v49 = vld [vmem:[#allocation15 + $0x30] sm:$0xff]   ;;  %v2809_v55 = vcombine.low %v4084_v1, %v4086_v2  ;;  %v2810_v56 = vcombine.low %v4088_v3, %v4090_v4 }
 0x2bb   : > { %1319 = vadd.xlane.f32.xlu0 %v1289_v36  ;;  %v1415_v50 = vpack.c.bf16 %v1405_v42, %v1404_v41  ;;  %v1416_v44 = vpack.c.bf16 %v1407_v43, %v1406_v58  ;;  %3142 = vmatprep.subr.bf16.mxu1 %v3413_v47  ;;  %v2811_v57 = vcombine.low %v4092_v5, %v4094_v6 }
 0x2bc   : > { %1321 = vadd.xlane.f32.xlu1 %v1290_v35  ;;  %v1417_v46 = vpack.c.bf16 %v1409_v39, %v1408_v45  ;;  %3143 = vmatpush3.bf16.msra.mxu1 %v3413_v47  ;;  %v2812_v59 = vcombine.low %v4105_v10, %v4107_v11  ;;  %v2813_v61 = vcombine.low %v4109_v12, %v4120_v16  ;;  %v4378_v39 = vld [vmem:[%s4731_s8] ss:$0 sm:$0xff] }
 0x2bd   : > { %3127 = vmatmul.mubr.bf16.vlgmr.msra.gmra.mrb[0].mxu0 %v1411_v63  ;;  %3144 = vmatprep.subr.bf16.mxu1 %v3414_v48  ;;  %v2814_v1 = vcombine.low %v4122_v17, %v4124_v18  ;;  %v2815_v2 = vcombine.low %v4135_v22, %v4137_v23  ;;  %v2816_v4 = vcombine.low %v4139_v24, %v4150_v28 }
 0x2be   : > { %3130 = vmatprep.mubr.bf16.mxu0 %v1412_v0 }
 0x2c0   : > { %3145 = vmatpush3.bf16.msra.mxu1 %v3414_v48 }
 0x2c1   : > { %3146 = vmatprep.subr.bf16.mxu1 %v3415_v62 }
 0x2c4   : > { %3147 = vmatpush3.bf16.msra.mxu1 %v3415_v62 }
 0x2c5   : > { %3131 = vmatmul.mubr.bf16.gmra.mrb[4].mxu0 %v1413_v33  ;;  %3148 = vmatprep.subr.bf16.mxu1 %v3416_v51 }
 0x2c6   : > { %3134 = vmatprep.mubr.bf16.mxu0 %v1414_v40 }
 0x2c8   : > { %3149 = vmatpush3.bf16.msra.mxu1 %v3416_v51 }
 0x2c9   : > { %3150 = vmatprep.subr.bf16.mxu1 %v3417_v52 }
 0x2cc   : > { %3151 = vmatpush3.bf16.msra.mxu1 %v3417_v52 }
 0x2cd   : > { %3135 = vmatmul.mubr.bf16.gmra.mrb[8].mxu0 %v1415_v50  ;;  %3152 = vmatprep.subr.bf16.mxu1 %v3418_v53 }
 0x2ce   : > { %3138 = vmatprep.mubr.bf16.mxu0 %v1416_v44 }
 0x2d0   : > { %3153 = vmatpush3.bf16.msra.mxu1 %v3418_v53 }
 0x2d1   : > { %3154 = vmatprep.subr.bf16.mxu1 %v3419_v49 }
 0x2d4   : > { %3155 = vmatpush3.bf16.msra.mxu1 %v3419_v49 }
 0x2d5   : > { %3139 = vmatmul.mubr.bf16.gmra.mrb[12].mxu0 %v1417_v46  ;;  %3156 = vmatprep.subr.bf16.mxu1 %v3420_v54 }
 0x2d8   : > { %3157 = vmatpush3.bf16.msra.mxu1 %v3420_v54 }
 0x2e8   : > { %1934 = vxpose.xlu0.c.b16.start [1/8] %v2809_v55, 128 }
 0x2ec   : > { %1935 = vxpose.xlu0.c.b16.cont [2/8] %v2810_v56, 128 }
 0x2f0   : > { %1936 = vxpose.xlu0.c.b16.cont [3/8] %v2811_v57, 128 }
 0x2f4   : > { %1937 = vxpose.xlu0.c.b16.cont [4/8] %v2812_v59, 128 }
 0x2f8   : > { %1938 = vxpose.xlu0.c.b16.cont [5/8] %v2813_v61, 128 }
 0x2fc   : > { %1939 = vxpose.xlu0.c.b16.cont [6/8] %v2814_v1, 128 }
 0x300   : > { %1940 = vxpose.xlu0.c.b16.cont [7/8] %v2815_v2, 128 }
 0x304   : > { %1941 = vxpose.xlu0.c.b16.end [8/8] %v2816_v4, 128 }
 0x32c   : > { %v1292_v3 = vpop.xlane.xlu0 %1291 }
 0x32d   : > { %v1296_v5 = vpop.xlane.xlu1 %1295  ;;  %vm1323_vm1 = vcmp.gt.f32.partialorder %v1292_v3, 0.0 }
 0x32e   : > { %vm1325_vm2 = vcmp.gt.f32.partialorder %v1296_v5, 0.0  ;;  %v1339_v18 = vsel %vm1323_vm1, %v1292_v3, 1.0 }
 0x32f   : > { %v1341_v22 = vsel %vm1325_vm2, %v1296_v5, 1.0  ;;  %3423 = vrcp.f32 %v1339_v18 }
 0x330   : > { %v1294_v6 = vpop.xlane.xlu0 %1293  ;;  %3425 = vrcp.f32 %v1341_v22 }
 0x331   : > { %v1298_v10 = vpop.xlane.xlu1 %1297  ;;  %vm1324_vm3 = vcmp.gt.f32.partialorder %v1294_v6, 0.0 }
 0x332   : > { %vm1326_vm4 = vcmp.gt.f32.partialorder %v1298_v10, 0.0  ;;  %v1340_v24 = vsel %vm1324_vm3, %v1294_v6, 1.0 }
 0x333   : > { %v1342_v28 = vsel %vm1326_vm4, %v1298_v10, 1.0  ;;  %3427 = vrcp.f32 %v1340_v24 }
 0x334   : > { %v4323_v11 = vpop.xlane.xlu0 %1299  ;;  %3429 = vrcp.f32 %v1342_v28 }
 0x335   : > { %v4325_v12 = vpop.xlane.xlu1 %1301  ;;  %vm1327_vm6 = vcmp.gt.f32.partialorder %v4323_v11, 0.0 }
 0x336   : > { %vm1328_vm8 = vcmp.gt.f32.partialorder %v4325_v12, 0.0  ;;  %v1343_v37 = vsel %vm1327_vm6, %v4323_v11, 1.0 }
 0x337   : > { %v1344_v60 = vsel %vm1328_vm8, %v4325_v12, 1.0 }
 0x338   : > { %v4327_v16 = vpop.xlane.xlu0 %1303 }
 0x339   : > { %v4329_v17 = vpop.xlane.xlu1 %1305  ;;  %vm1329_vm5 = vcmp.gt.f32.partialorder %v4327_v16, 0.0  ;;  %v3424_v38 = vpop.eup %3423 }
 0x33a   : > { %vm1330_vm7 = vcmp.gt.f32.partialorder %v4329_v17, 0.0  ;;  %v1345_v36 = vsel %vm1329_vm5, %v4327_v16, 1.0  ;;  %v3426_v40 = vpop.eup %3425  ;;  %v1371_v48 = vsel %vm1323_vm1, %v3424_v38, 0.0 }
 0x33b   : > { %v1346_v35 = vsel %vm1330_vm7, %v4329_v17, 1.0  ;;  %3431 = vrcp.f32 %v1345_v36  ;;  %v1373_v44 = vsel %vm1325_vm2, %v3426_v40, 0.0 }
 0x33c   : > { %v4333_v23 = vpop.xlane.xlu0 %1307  ;;  %3433 = vrcp.f32 %v1343_v37 }
 0x33d   : > { %v4337_v63 = vpop.xlane.xlu1 %1309  ;;  %vm1331_vm9 = vcmp.gt.f32.partialorder %v4333_v23, 0.0  ;;  %3435 = vrcp.f32 %v1346_v35  ;;  %v3428_v41 = vpop.eup %3427 }
 0x33e   : > { %3437 = vrcp.f32 %v1344_v60  ;;  %vm1332_vm11 = vcmp.gt.f32.partialorder %v4337_v63, 0.0  ;;  %v3430_v58 = vpop.eup %3429  ;;  %v1347_v43 = vsel %vm1331_vm9, %v4333_v23, 1.0  ;;  %v1372_v51 = vsel %vm1324_vm3, %v3428_v41, 0.0 }
 0x33f   : > { %v1348_v46 = vsel %vm1332_vm11, %v4337_v63, 1.0  ;;  %3439 = vrcp.f32 %v1347_v43  ;;  %v1374_v54 = vsel %vm1326_vm4, %v3430_v58, 0.0 }
 0x340   : > { %v4341_v0 = vpop.xlane.xlu0 %1311 }
 0x341   : > { %v4348_v34 = vpop.xlane.xlu1 %1313  ;;  %vm1333_vm10 = vcmp.gt.f32.partialorder %v4341_v0, 0.0 }
 0x342   : > { %vm1334_vm12 = vcmp.gt.f32.partialorder %v4348_v34, 0.0  ;;  %v1349_v50 = vsel %vm1333_vm10, %v4341_v0, 1.0 }
 0x343   : > { %v1350_v52 = vsel %vm1334_vm12, %v4348_v34, 1.0  ;;  %3441 = vrcp.f32 %v1349_v50 }
 0x344   : > { %v4360_v33 = vpop.xlane.xlu0 %1315  ;;  %3443 = vrcp.f32 %v1348_v46 }
 0x345   : > { %v4364_v42 = vpop.xlane.xlu1 %1317  ;;  %vm1335_vm13 = vcmp.gt.f32.partialorder %v4360_v33, 0.0  ;;  %v3432_v4 = vpop.eup %3431  ;;  %3445 = vrcp.f32 %v1350_v52 }
 0x346   : > { %v1351_v56 = vsel %vm1335_vm13, %v4360_v33, 1.0  ;;  %v3434_v10 = vpop.eup %3433  ;;  %vm1336_vm15 = vcmp.gt.f32.partialorder %v4364_v42, 0.0  ;;  %v1377_v60 = vsel %vm1329_vm5, %v3432_v4, 0.0 }
 0x347   : > { %3447 = vrcp.f32 %v1351_v56  ;;  %v3436_v24 = vpop.eup %3435  ;;  %v1352_v40 = vsel %vm1336_vm15, %v4364_v42, 1.0  ;;  %v1375_v58 = vsel %vm1327_vm6, %v3434_v10, 0.0 }
 0x348   : > { %v4388_v49 = vpop.xlane.xlu0 %1319  ;;  %v3438_v36 = vpop.eup %3437  ;;  %v1378_v16 = vsel %vm1330_vm7, %v3436_v24, 0.0 }
 0x349   : > { %v4396_v2 = vpop.xlane.xlu1 %1321  ;;  %vm1337_vm14 = vcmp.gt.f32.partialorder %v4388_v49, 0.0 }
 0x34a   : > { %vm1338_vm0 = vcmp.gt.f32.partialorder %v4396_v2, 0.0  ;;  %v1353_v37 = vsel %vm1337_vm14, %v4388_v49, 1.0 }
 0x34b   : > { %v1354_v50 = vsel %vm1338_vm0, %v4396_v2, 1.0 }
 0x390   : > { %v3128_v45 = vpop.f32.mrb[0].mxu0 }
 0x391   : > { %v1541_v47 = vmul.f32 %v3128_v45, %v1373_v44  ;;  %v1476_v62 = vpop.f32.mrb[1].mxu0 }
 0x392   : > { %v1539_v53 = vmul.f32 %v1476_v62, %v1371_v48  ;;  %v3129_v55 = vpop.f32.mrb[2].mxu0  ;;  %v1376_v48 = vsel %vm1328_vm8, %v3438_v36, 0.0  ;;  %v3440_v62 = vpop.eup %3439 }
 0x393   : > { %v1564_v57 = vadd.f32 %v4378_v39, %v1541_v47  ;;  %v1542_v59 = vmul.f32 %v3129_v55, %v1374_v54  ;;  %v1479_v61 = vpop.f32.mrb[3].mxu0  ;;  %v1379_v10 = vsel %vm1331_vm9, %v3440_v62, 0.0 }
 0x394   : > { %v1562_v1 = vadd.f32 %v4378_v39, %v1539_v53  ;;  %v1540_v3 = vmul.f32 %v1479_v61, %v1372_v51  ;;  %v3442_v53 = vpop.eup %3441 }
 0x395   : > { %v2763_v5 = vmul.f32 -1.442695, %v1564_v57  ;;  %v1565_v6 = vadd.f32 %v4378_v39, %v1542_v59  ;;  %v3444_v55 = vpop.eup %3443 }
 0x396   : > { %v2761_v18 = vmul.f32 -1.442695, %v1562_v1  ;;  %v1563_v22 = vadd.f32 %v4378_v39, %v1540_v3  ;;  %v3446_v59 = vpop.eup %3445  ;;  %v1381_v3 = vsel %vm1333_vm10, %v3442_v53, 0.0 }
 0x397   : > { %3449 = vpow2.f32 %v2763_v5  ;;  %v2764_v28 = vmul.f32 -1.442695, %v1565_v6  ;;  %v3448_v12 = vpop.eup %3447 }
 0x398   : > { %3451 = vpow2.f32 %v2761_v18  ;;  %v2762_v35 = vmul.f32 -1.442695, %v1563_v22  ;;  %v3132_v38 = vpop.f32.mrb[4].mxu0  ;;  %v1674_v22 = vlaneseq }
 0x399   : > { %3453 = vpow2.f32 %v2764_v28  ;;  %v1545_v41 = vmul.f32 %v3132_v38, %v1377_v60  ;;  %v1492_v43 = vpop.f32.mrb[5].mxu0 }
 0x39a   : > { %3455 = vpow2.f32 %v2762_v35  ;;  %v1543_v44 = vmul.f32 %v1492_v43, %v1375_v58  ;;  %v3133_v45 = vpop.f32.mrb[6].mxu0 }
 0x39b   : > { %3457 = vrcp.f32 %v1353_v37  ;;  %v1568_v46 = vadd.f32 %v4378_v39, %v1545_v41  ;;  %v1546_v47 = vmul.f32 %v3133_v45, %v1378_v16  ;;  %v1495_v11 = vpop.f32.mrb[7].mxu0  ;;  %v1382_v37 = vsel %vm1334_vm12, %v3446_v59, 0.0 }
 0x39c   : > { %3459 = vrcp.f32 %v1352_v40  ;;  %v1566_v51 = vadd.f32 %v4378_v39, %v1543_v44  ;;  %v1544_v52 = vmul.f32 %v1495_v11, %v1376_v48  ;;  %v1380_v41 = vsel %vm1332_vm11, %v3444_v55, 0.0 }
 0x39d   : > { %3461 = vrcp.f32 %v1354_v50  ;;  %v2767_v54 = vmul.f32 -1.442695, %v1568_v46  ;;  %v1569_v17 = vadd.f32 %v4378_v39, %v1546_v47 }
 0x39e   : > { %v2765_v56 = vmul.f32 -1.442695, %v1566_v51  ;;  %v1567_v57 = vadd.f32 %v4378_v39, %v1544_v52 }
 0x39f   : > { %3463 = vpow2.f32 %v2767_v54  ;;  %v2768_v61 = vmul.f32 -1.442695, %v1569_v17  ;;  %v1675_v54 = vand.u32 127, %v1674_v22 }
 0x3a0   : > { %3465 = vpow2.f32 %v2765_v56  ;;  %v2766_v1 = vmul.f32 -1.442695, %v1567_v57  ;;  %v3136_v4 = vpop.f32.mrb[8].mxu0  ;;  %v1383_v56 = vsel %vm1335_vm13, %v3448_v12, 0.0 }
 0x3a1   : > { %v3450_v5 = vpop.eup %3449  ;;  %3467 = vpow2.f32 %v2768_v61  ;;  %v1549_v6 = vmul.f32 %v3136_v4, %v1381_v3  ;;  %v1508_v18 = vpop.f32.mrb[9].mxu0  ;;  %vm1676_vm1 = vcmp.lt.s32.totalorder %v1675_v54, 64 }
 0x3a2   : > { %v3452_v24 = vpop.eup %3451  ;;  %v1628_v28 = vadd.f32 1.0, %v3450_v5  ;;  %3469 = vpow2.f32 %v2766_v1  ;;  %v1547_v36 = vmul.f32 %v1508_v18, %v1379_v10  ;;  %v3137_v35 = vpop.f32.mrb[10].mxu0  ;;  %vm4448_vm2 = vmpackc.low %vm1676_vm1, %vm1676_vm1 }
 0x3a3   : > { %v3454_v60 = vpop.eup %3453  ;;  %v1626_v0 = vadd.f32 1.0, %v3452_v24  ;;  %v1572_v38 = vadd.f32 %v4378_v39, %v1549_v6  ;;  %v1550_v40 = vmul.f32 %v3137_v35, %v1382_v37  ;;  %v1511_v23 = vpop.f32.mrb[11].mxu0 }
 0x3a4   : > { %v3456_v58 = vpop.eup %3455  ;;  %3471 = vrcp.f32 %v1628_v28  ;;  %v1629_v43 = vadd.f32 1.0, %v3454_v60  ;;  %v1570_v50 = vadd.f32 %v4378_v39, %v1547_v36  ;;  %v1548_v44 = vmul.f32 %v1511_v23, %v1380_v41 }
 0x3a5   : > { %v3458_v16 = vpop.eup %3457  ;;  %3473 = vrcp.f32 %v1626_v0  ;;  %v1627_v34 = vadd.f32 1.0, %v3456_v58  ;;  %v2771_v45 = vmul.f32 -1.442695, %v1572_v38  ;;  %v1573_v46 = vadd.f32 %v4378_v39, %v1550_v40 }
 0x3a6   : > { %v3460_v47 = vpop.eup %3459  ;;  %3475 = vrcp.f32 %v1629_v43  ;;  %v2769_v48 = vmul.f32 -1.442695, %v1570_v50  ;;  %v1571_v11 = vadd.f32 %v4378_v39, %v1548_v44  ;;  %v1385_v52 = vsel %vm1337_vm14, %v3458_v16, 0.0 }
 0x3a7   : > { %v3462_v63 = vpop.eup %3461  ;;  %3477 = vrcp.f32 %v1627_v34  ;;  %v2772_v62 = vmul.f32 -1.442695, %v1573_v46  ;;  %v1384_v59 = vsel %vm1336_vm15, %v3460_v47, 0.0 }
 0x3a8   : > { %3479 = vpow2.f32 %v2771_v45  ;;  %v2770_v51 = vmul.f32 -1.442695, %v1571_v11  ;;  %v3140_v53 = vpop.f32.mrb[12].mxu0  ;;  %v1386_v49 = vsel %vm1338_vm0, %v3462_v63, 0.0 }
 0x3a9   : > { %v3464_v17 = vpop.eup %3463  ;;  %3481 = vpow2.f32 %v2769_v48  ;;  %v1553_v55 = vmul.f32 %v3140_v53, %v1385_v52  ;;  %v1524_v57 = vpop.f32.mrb[13].mxu0 }
 0x3aa   : > { %v3466_v61 = vpop.eup %3465  ;;  %v1632_v1 = vadd.f32 1.0, %v3464_v17  ;;  %3483 = vpow2.f32 %v2772_v62  ;;  %v1551_v3 = vmul.f32 %v1524_v57, %v1383_v56  ;;  %v3141_v4 = vpop.f32.mrb[14].mxu0 }
 0x3ab   : > { %v3468_v5 = vpop.eup %3467  ;;  %v1630_v6 = vadd.f32 1.0, %v3466_v61  ;;  %3485 = vpow2.f32 %v2770_v51  ;;  %v1576_v10 = vadd.f32 %v4378_v39, %v1553_v55  ;;  %v1554_v18 = vmul.f32 %v3141_v4, %v1386_v49  ;;  %v1527_v33 = vpop.f32.mrb[15].mxu0 }
 0x3ac   : > { %v3470_v12 = vpop.eup %3469  ;;  %3487 = vrcp.f32 %v1632_v1  ;;  %v1633_v22 = vadd.f32 1.0, %v3468_v5  ;;  %v1574_v42 = vadd.f32 %v4378_v39, %v1551_v3  ;;  %v1552_v24 = vmul.f32 %v1527_v33, %v1384_v59 }
 0x3ad   : > { %3489 = vrcp.f32 %v1630_v6  ;;  %v1631_v28 = vadd.f32 1.0, %v3470_v12  ;;  %v2775_v36 = vmul.f32 -1.442695, %v1576_v10  ;;  %v1577_v2 = vadd.f32 %v4378_v39, %v1554_v18 }
 0x3ae   : > { %v3472_v37 = vpop.eup %3471  ;;  %3491 = vrcp.f32 %v1633_v22  ;;  %v2773_v35 = vmul.f32 -1.442695, %v1574_v42  ;;  %v1575_v60 = vadd.f32 %v4378_v39, %v1552_v24 }
 0x3af   : > { %v3474_v0 = vpop.eup %3473  ;;  %3493 = vrcp.f32 %v1631_v28  ;;  %v2776_v38 = vmul.f32 -1.442695, %v1577_v2  ;;  %v1942_v28 = vpop.trf.xlu0 }
 0x3b0   : > { %v3476_v40 = vpop.eup %3475  ;;  %3495 = vpow2.f32 %v2775_v36  ;;  %v2774_v41 = vmul.f32 -1.442695, %v1575_v60  ;;  %3190 = vmatprep.mubr.bf16.mxu0 %v1942_v28 }
 0x3b1   : > { %v3478_v23 = vpop.eup %3477  ;;  %3497 = vpow2.f32 %v2773_v35  ;;  %v2789_v43 = vpack.c.bf16 %v3476_v40, %v3472_v37 }
 0x3b2   : > { %v3480_v50 = vpop.eup %3479  ;;  %3499 = vpow2.f32 %v2776_v38  ;;  %v2786_v44 = vpack.c.bf16 %v3478_v23, %v3474_v0 }
 0x3b3   : > { %v3482_v16 = vpop.eup %3481  ;;  %v1636_v34 = vadd.f32 1.0, %v3480_v50  ;;  %3501 = vpow2.f32 %v2774_v41  ;;  %v1943_v36 = vpop.trf.xlu0 }
 0x3b4   : > { %v3484_v39 = vpop.eup %3483  ;;  %v1634_v45 = vadd.f32 1.0, %v3482_v16  ;;  %3158 = vmatprep.mubr.msk.bf16.mxu1 %vm4448_vm2, %v2786_v44 }
 0x3b5   : > { %v3486_v46 = vpop.eup %3485  ;;  %3503 = vrcp.f32 %v1636_v34  ;;  %v1637_v47 = vadd.f32 1.0, %v3484_v39  ;;  %3159 = vmatmul.mubr.msk.bf16.vlgmr.msra.gmra.mrb[0].mxu1 %vm4448_vm2, %v2789_v43 }
 0x3b6   : > { %v3488_v48 = vpop.eup %3487  ;;  %3505 = vrcp.f32 %v1634_v45  ;;  %v1635_v11 = vadd.f32 1.0, %v3486_v46 }
 0x3b7   : > { %v3490_v63 = vpop.eup %3489  ;;  %3507 = vrcp.f32 %v1637_v47  ;;  %v4468_v2 = vpop.trf.xlu0 }
 0x3b8   : > { %v3492_v62 = vpop.eup %3491  ;;  %3509 = vrcp.f32 %v1635_v11 }
 0x3b9   : > { %v3494_v51 = vpop.eup %3493  ;;  %v2795_v52 = vpack.c.bf16 %v3492_v62, %v3488_v48 }
 0x3ba   : > { %v3496_v53 = vpop.eup %3495  ;;  %v2792_v54 = vpack.c.bf16 %v3494_v51, %v3490_v63 }
 0x3bb   : > { %v3498_v17 = vpop.eup %3497  ;;  %v1640_v55 = vadd.f32 1.0, %v3496_v53  ;;  %v4470_v37 = vpop.trf.xlu0 }
 0x3bc   : > { %v3500_v56 = vpop.eup %3499  ;;  %v1638_v57 = vadd.f32 1.0, %v3498_v17  ;;  %3162 = vmatprep.mubr.msk.bf16.mxu1 %vm4448_vm2, %v2792_v54 }
 0x3bd   : > { %v3502_v59 = vpop.eup %3501  ;;  %3511 = vrcp.f32 %v1640_v55  ;;  %v1641_v61 = vadd.f32 1.0, %v3500_v56  ;;  %3163 = vmatmul.mubr.msk.bf16.gmra.mrb[4].mxu1 %vm4448_vm2, %v2795_v52 }
 0x3be   : > { %3513 = vrcp.f32 %v1638_v57  ;;  %v1639_v1 = vadd.f32 1.0, %v3502_v59  ;;  %v1864_v57 = vld [vmem:[#allocation6 + $0x10] sm:$0xff] }
 0x3bf   : > { %v3504_v3 = vpop.eup %3503  ;;  %3515 = vrcp.f32 %v1641_v61  ;;  %v1946_v35 = vpop.trf.xlu0  ;;  %v1872_v59 = vld [vmem:[#allocation6 + $0x50] sm:$0xff]  ;;  %v1862_v61 = vld [vmem:[#allocation6] sm:$0xff] }
 0x3c0   : > { %v3506_v49 = vpop.eup %3505  ;;  %3517 = vrcp.f32 %v1639_v1  ;;  %v1870_v1 = vld [vmem:[#allocation6 + $0x40] sm:$0xff] }
 0x3c1   : > { %v3508_v4 = vpop.eup %3507 }
 0x3c2   : > { %v3510_v5 = vpop.eup %3509  ;;  %v2801_v6 = vpack.c.bf16 %v3508_v4, %v3504_v3  ;;  %v1865_v4 = vld [vmem:[#allocation6 + $0x18] sm:$0xff] }
 0x3c3   : > { %v2798_v10 = vpack.c.bf16 %v3510_v5, %v3506_v49  ;;  %v1947_v17 = vpop.trf.xlu0  ;;  %v1873_v5 = vld [vmem:[#allocation6 + $0x58] sm:$0xff] }
 0x3c5   : > { %3166 = vmatprep.mubr.msk.bf16.mxu1 %vm4448_vm2, %v2798_v10 }
 0x3c6   : > { %3167 = vmatmul.mubr.msk.bf16.gmra.mrb[8].mxu1 %vm4448_vm2, %v2801_v6 }
 0x3c7   : > { %v3512_v18 = vpop.eup %3511  ;;  %v1948_v55 = vpop.trf.xlu0 }
 0x3c8   : > { %v3514_v33 = vpop.eup %3513 }
 0x3c9   : > { %v3516_v12 = vpop.eup %3515 }
 0x3ca   : > { %v3518_v22 = vpop.eup %3517  ;;  %v2807_v42 = vpack.c.bf16 %v3516_v12, %v3512_v18  ;;  %v1863_v12 = vld [vmem:[#allocation6 + $0x8] sm:$0xff] }
 0x3cb   : > { %v2804_v24 = vpack.c.bf16 %v3518_v22, %v3514_v33  ;;  %v1949_v56 = vpop.trf.xlu0  ;;  %v1871_v22 = vld [vmem:[#allocation6 + $0x48] sm:$0xff] }
 0x3cd   : > { %3170 = vmatprep.mubr.msk.bf16.mxu1 %vm4448_vm2, %v2804_v24 }
 0x3ce   : > { %3171 = vmatmul.mubr.msk.bf16.gmra.mrb[12].mxu1 %vm4448_vm2, %v2807_v42 }
 0x3cf   : > { %3198 = vmatprep.mubr.bf16.mxu1 %v1946_v35 }
 0x488   : > { %v3160_v60 = vpop.f32.mrb[0].mxu1 }
 0x489   : > { %v1799_v0 = vpop.f32.mrb[1].mxu1 }
 0x48a   : > { %v3161_v38 = vpop.f32.mrb[2].mxu1 }
 0x48b   : > { %v1879_v40 = vpack.c.bf16 %v3161_v38, %v3160_v60  ;;  %v1802_v41 = vpop.f32.mrb[3].mxu1 }
 0x48c   : > { %v1878_v23 = vpack.c.bf16 %v1802_v41, %v1799_v0  ;;  %v1876_v41 = vld [vmem:[#allocation6 + $0x70] sm:$0xff] }
 0x48e   : > { %3174 = vmatprep.subr.bf16.mxu0 %v1878_v23  ;;  %3254 = vmatprep.subr.bf16.mxu1 %v1878_v23 }
 0x48f   : > { %3175 = vmatpush3.bf16.msra.mxu0 %v1878_v23  ;;  %3262 = vmatpush3.bf16.msra.mxu1 %v1878_v23  ;;  %v1866_v23 = vld [vmem:[#allocation6 + $0x20] sm:$0xff] }
 0x490   : > { %v3164_v58 = vpop.f32.mrb[4].mxu1  ;;  %3176 = vmatprep.subr.bf16.mxu0 %v1879_v40  ;;  %3255 = vmatprep.subr.bf16.mxu1 %v1879_v40 }
 0x491   : > { %v1815_v43 = vpop.f32.mrb[5].mxu1 }
 0x492   : > { %v3165_v50 = vpop.f32.mrb[6].mxu1 }
 0x493   : > { %v1881_v44 = vpack.c.bf16 %v3165_v50, %v3164_v58  ;;  %v1818_v16 = vpop.f32.mrb[7].mxu1  ;;  %3177 = vmatpush3.bf16.msra.mxu0 %v1879_v40  ;;  %3263 = vmatpush3.bf16.msra.mxu1 %v1879_v40  ;;  %v1868_v40 = vld [vmem:[#allocation6 + $0x30] sm:$0xff]  ;;  %v1874_v58 = vld [vmem:[#allocation6 + $0x60] sm:$0xff] }
 0x494   : > { %v1880_v34 = vpack.c.bf16 %v1818_v16, %v1815_v43  ;;  %v1877_v16 = vld [vmem:[#allocation6 + $0x78] sm:$0xff] }
 0x496   : > { %3178 = vmatprep.subr.bf16.mxu0 %v1880_v34  ;;  %3256 = vmatprep.subr.bf16.mxu1 %v1880_v34 }
 0x497   : > { %3179 = vmatpush3.bf16.msra.mxu0 %v1880_v34  ;;  %3264 = vmatpush3.bf16.msra.mxu1 %v1880_v34 }
 0x498   : > { %3180 = vmatprep.subr.bf16.mxu0 %v1881_v44  ;;  %3257 = vmatprep.subr.bf16.mxu1 %v1881_v44 }
 0x499   : > { %v3168_v39 = vpop.f32.mrb[8].mxu1 }
 0x49a   : > { %v1831_v45 = vpop.f32.mrb[9].mxu1 }
 0x49b   : > { %v3169_v46 = vpop.f32.mrb[10].mxu1  ;;  %3181 = vmatpush3.bf16.msra.mxu0 %v1881_v44  ;;  %3265 = vmatpush3.bf16.msra.mxu1 %v1881_v44  ;;  %v1869_v44 = vld [vmem:[#allocation6 + $0x38] sm:$0xff] }
 0x49c   : > { %v1883_v47 = vpack.c.bf16 %v3169_v46, %v3168_v39  ;;  %v1834_v48 = vpop.f32.mrb[11].mxu1 }
 0x49d   : > { %v1882_v11 = vpack.c.bf16 %v1834_v48, %v1831_v45  ;;  %v1875_v48 = vld [vmem:[#allocation6 + $0x68] sm:$0xff] }
 0x49f   : > { %3182 = vmatprep.subr.bf16.mxu0 %v1882_v11  ;;  %3258 = vmatprep.subr.bf16.mxu1 %v1882_v11 }
 0x4a0   : > { %3183 = vmatpush3.bf16.msra.mxu0 %v1882_v11  ;;  %3266 = vmatpush3.bf16.msra.mxu1 %v1882_v11 }
 0x4a1   : > { %v3172_v63 = vpop.f32.mrb[12].mxu1  ;;  %3184 = vmatprep.subr.bf16.mxu0 %v1883_v47  ;;  %3259 = vmatprep.subr.bf16.mxu1 %v1883_v47 }
 0x4a2   : > { %v1847_v62 = vpop.f32.mrb[13].mxu1 }
 0x4a3   : > { %v3173_v51 = vpop.f32.mrb[14].mxu1 }
 0x4a4   : > { %v1885_v52 = vpack.c.bf16 %v3173_v51, %v3172_v63  ;;  %v1850_v53 = vpop.f32.mrb[15].mxu1  ;;  %3185 = vmatpush3.bf16.msra.mxu0 %v1883_v47  ;;  %3267 = vmatpush3.bf16.msra.mxu1 %v1883_v47  ;;  %v1867_v47 = vld [vmem:[#allocation6 + $0x28] sm:$0xff] }
 0x4a5   : > { %v1884_v54 = vpack.c.bf16 %v1850_v53, %v1847_v62 }
 0x4a7   : > { %3186 = vmatprep.subr.bf16.mxu0 %v1884_v54  ;;  %3260 = vmatprep.subr.bf16.mxu1 %v1884_v54 }
 0x4a8   : > { %3187 = vmatpush3.bf16.msra.mxu0 %v1884_v54  ;;  %3268 = vmatpush3.bf16.msra.mxu1 %v1884_v54 }
 0x4a9   : > { %3188 = vmatprep.subr.bf16.mxu0 %v1885_v52  ;;  %3261 = vmatprep.subr.bf16.mxu1 %v1885_v52 }
 0x4ac   : > { %3189 = vmatpush3.bf16.msra.mxu0 %v1885_v52  ;;  %3269 = vmatpush3.bf16.msra.mxu1 %v1885_v52 }
 0x4af   : > { %3191 = vmatmul.mubr.bf16.vlgmr.msra.gmra.mrb[16].mxu0 %v1943_v36  ;;  %3199 = vmatmul.mubr.bf16.vlgmr.msra.gmra.mrb[16].mxu1 %v1947_v17 }
 0x4b0   : > { %3194 = vmatprep.mubr.bf16.mxu0 %v4468_v2  ;;  %3202 = vmatprep.mubr.bf16.mxu1 %v1948_v55 }
 0x4b7   : > { %3195 = vmatmul.mubr.bf16.gmra.mrb[20].mxu0 %v4470_v37  ;;  %3203 = vmatmul.mubr.bf16.gmra.mrb[20].mxu1 %v1949_v56 }
 0x582   : > { %v3192_v3 = vpop.f32.mrb[16].mxu0  ;;  %v3200_v49 = vpop.f32.mrb[16].mxu1 }
 0x583   : > { %v2049_v6 = vadd.f32 %v3192_v3, %v1864_v57  ;;  %v2057_v10 = vadd.f32 %v3200_v49, %v1872_v59  ;;  %v1984_v18 = vpop.f32.mrb[17].mxu0  ;;  %v2016_v33 = vpop.f32.mrb[17].mxu1 }
 0x584   : > { %v2047_v42 = vadd.f32 %v1984_v18, %v1862_v61  ;;  %v2055_v24 = vadd.f32 %v2016_v33, %v1870_v1  ;;  %v3193_v28 = vpop.f32.mrb[18].mxu0  ;;  %v3201_v36 = vpop.f32.mrb[18].mxu1 }
 0x585   : > { %2065 = vst [vmem:[#allocation6 + $0x10] sm:$0xff] %v2049_v6  ;;  %2073 = vst [vmem:[#allocation6 + $0x50] sm:$0xff] %v2057_v10  ;;  %v2050_v2 = vadd.f32 %v3193_v28, %v1865_v4  ;;  %v2058_v37 = vadd.f32 %v3201_v36, %v1873_v5  ;;  %v1987_v35 = vpop.f32.mrb[19].mxu0  ;;  %v2019_v60 = vpop.f32.mrb[19].mxu1 }
 0x586   : > { %2063 = vst [vmem:[#allocation6] sm:$0xff] %v2047_v42  ;;  %2071 = vst [vmem:[#allocation6 + $0x40] sm:$0xff] %v2055_v24  ;;  %v2048_v0 = vadd.f32 %v1987_v35, %v1863_v12  ;;  %v2056_v38 = vadd.f32 %v2019_v60, %v1871_v22 }
 0x587   : > { %2066 = vst [vmem:[#allocation6 + $0x18] sm:$0xff] %v2050_v2  ;;  %2074 = vst [vmem:[#allocation6 + $0x58] sm:$0xff] %v2058_v37 }
 0x588   : > { %2064 = vst [vmem:[#allocation6 + $0x8] sm:$0xff] %v2048_v0  ;;  %2072 = vst [vmem:[#allocation6 + $0x48] sm:$0xff] %v2056_v38 }
 0x58a   : > { %v3196_v43 = vpop.f32.mrb[20].mxu0  ;;  %v3204_v50 = vpop.f32.mrb[20].mxu1 }
 0x58b   : > { %v2053_v34 = vadd.f32 %v3196_v43, %v1868_v40  ;;  %v2061_v39 = vadd.f32 %v3204_v50, %v1876_v41  ;;  %v2000_v45 = vpop.f32.mrb[21].mxu0  ;;  %v2032_v46 = vpop.f32.mrb[21].mxu1 }
 0x58c   : > { %v2051_v11 = vadd.f32 %v2000_v45, %v1866_v23  ;;  %v2059_v63 = vadd.f32 %v2032_v46, %v1874_v58  ;;  %v3197_v62 = vpop.f32.mrb[22].mxu0  ;;  %v3205_v51 = vpop.f32.mrb[22].mxu1 }
 0x58d   : > { %2069 = vst [vmem:[#allocation6 + $0x30] sm:$0xff] %v2053_v34  ;;  %2077 = vst [vmem:[#allocation6 + $0x70] sm:$0xff] %v2061_v39  ;;  %v2054_v52 = vadd.f32 %v3197_v62, %v1869_v44  ;;  %v2062_v53 = vadd.f32 %v3205_v51, %v1877_v16  ;;  %v2003_v54 = vpop.f32.mrb[23].mxu0  ;;  %v2035_v17 = vpop.f32.mrb[23].mxu1 }
 0x58e   : > { %2067 = vst [vmem:[#allocation6 + $0x20] sm:$0xff] %v2051_v11  ;;  %2075 = vst [vmem:[#allocation6 + $0x60] sm:$0xff] %v2059_v63  ;;  %v2052_v55 = vadd.f32 %v2003_v54, %v1867_v47  ;;  %v2060_v56 = vadd.f32 %v2035_v17, %v1875_v48 }
 0x58f   : > { %2070 = vst [vmem:[#allocation6 + $0x38] sm:$0xff] %v2054_v52  ;;  %2078 = vst [vmem:[#allocation6 + $0x78] sm:$0xff] %v2062_v53 }
 0x590   : > { %2068 = vst [vmem:[#allocation6 + $0x28] sm:$0xff] %v2052_v55  ;;  %2076 = vst [vmem:[#allocation6 + $0x68] sm:$0xff] %v2060_v56 }
 0x591 PF: > { %p2817_p7 = scmp.ne.s32.totalorder %s3819_s19, 2 }
 0x592   : > { %v2233_v57 = vld [vmem:[#allocation6] sm:$0xff] (!%p2817_p7)  ;;  %v2234_v59 = vld [vmem:[#allocation6 + $0x8] sm:$0xff] (!%p2817_p7)  ;;  %v2235_v61 = vld [vmem:[#allocation6 + $0x10] sm:$0xff] (!%p2817_p7) }
 0x593   : > { %2082 = sbr.rel (%p2817_p7) target bundleno = 1733 (0x6c5), region = 104  ;;  %v2249_v1 = vpack.c.bf16 (!%p2817_p7), %v2234_v59, %v2233_v57  ;;  %v2236_v3 = vld [vmem:[#allocation6 + $0x18] sm:$0xff] (!%p2817_p7)  ;;  %v2241_v35 = vld [vmem:[#allocation6 + $0x40] sm:$0xff] (!%p2817_p7)  ;;  %v2242_v60 = vld [vmem:[#allocation6 + $0x48] sm:$0xff] (!%p2817_p7) }
 0x594   : > { %v2250_v49 = vpack.c.bf16 (!%p2817_p7), %v2236_v3, %v2235_v61  ;;  %v4475_v10 = vld [vmem:[#allocation4] ss:$0 sm:$0xff] (!%p2817_p7)  ;;  %v2239_v18 = vld [vmem:[#allocation6 + $0x30] sm:$0xff] (!%p2817_p7)  ;;  %v4485_v37 = vld [vmem:[#allocation2] ss:$0 sm:$0xff] (!%p2817_p7)  ;;  %v2253_v40 = vpack.c.bf16 (!%p2817_p7), %v2242_v60, %v2241_v35 }
 0x595   : > { %v2237_v4 = vld [vmem:[#allocation6 + $0x20] sm:$0xff] (!%p2817_p7)  ;;  %3206 = vmatprep.subr.bf16.mxu0 (!%p2817_p7), %v2249_v1  ;;  %3270 = vmatprep.subr.bf16.mxu1 (!%p2817_p7), %v2249_v1  ;;  %v2209_v12 = vmul.f32 (!%p2817_p7), %v4475_v10, %v4097_v7  ;;  %v2210_v22 = vmul.f32 (!%p2817_p7), %v4475_v10, %v4100_v8  ;;  %v2217_v42 = vmul.f32 (!%p2817_p7), %v4475_v10, %v4133_v21  ;;  %v2243_v41 = vld [vmem:[#allocation6 + $0x50] sm:$0xff] (!%p2817_p7)  ;;  %v2244_v23 = vld [vmem:[#allocation6 + $0x58] sm:$0xff] (!%p2817_p7) }
 0x596   : > { %3207 = vmatpush3.bf16.msra.mxu0 (!%p2817_p7), %v2249_v1  ;;  %3278 = vmatpush3.bf16.msra.mxu1 (!%p2817_p7), %v2249_v1  ;;  %v2240_v33 = vld [vmem:[#allocation6 + $0x38] sm:$0xff] (!%p2817_p7)  ;;  %v2218_v24 = vmul.f32 (!%p2817_p7), %v4475_v10, %v4142_v25  ;;  %v2092_v0 = vmul.f32 (!%p2817_p7), %v4485_v37, %v4103_v9  ;;  %v2090_v38 = vmul.f32 (!%p2817_p7), %v4485_v37, %v4097_v7  ;;  %v2245_v44 = vld [vmem:[#allocation6 + $0x60] sm:$0xff] (!%p2817_p7)  ;;  %v2247_v39 = vld [vmem:[#allocation6 + $0x70] sm:$0xff] (!%p2817_p7) }
 0x597   : > { %v2238_v5 = vld [vmem:[#allocation6 + $0x28] sm:$0xff] (!%p2817_p7)  ;;  %3208 = vmatprep.subr.bf16.mxu0 (!%p2817_p7), %v2250_v49  ;;  %3271 = vmatprep.subr.bf16.mxu1 (!%p2817_p7), %v2250_v49  ;;  %v2225_v28 = vpack.c.bf16 (!%p2817_p7), %v2210_v22, %v2209_v12  ;;  %v2252_v36 = vpack.c.bf16 (!%p2817_p7), %v2240_v33, %v2239_v18  ;;  %v2093_v58 = vmul.f32 (!%p2817_p7), %v4485_v37, %v4112_v13  ;;  %v2248_v45 = vld [vmem:[#allocation6 + $0x78] sm:$0xff] (!%p2817_p7) }
 0x598   : > { %v2251_v6 = vpack.c.bf16 (!%p2817_p7), %v2238_v5, %v2237_v4  ;;  %v2229_v2 = vpack.c.bf16 (!%p2817_p7), %v2218_v24, %v2217_v42  ;;  %2110 = vadd.xlane.f32.xlu1 (!%p2817_p7), %v2092_v0  ;;  %2106 = vadd.xlane.f32.xlu0 (!%p2817_p7), %v2090_v38  ;;  %v2091_v43 = vmul.f32 (!%p2817_p7), %v4485_v37, %v4100_v8  ;;  %v2246_v7 = vld [vmem:[#allocation6 + $0x68] sm:$0xff] (!%p2817_p7) }
 0x599   : > { %3222 = vmatprep.mubr.bf16.mxu0 (!%p2817_p7), %v2225_v28  ;;  %v2254_v50 = vpack.c.bf16 (!%p2817_p7), %v2244_v23, %v2243_v41  ;;  %v2095_v16 = vmul.f32 (!%p2817_p7), %v4485_v37, %v4118_v15  ;;  %v2094_v34 = vmul.f32 (!%p2817_p7), %v4485_v37, %v4115_v14  ;;  %v2255_v8 = vpack.c.bf16 (!%p2817_p7), %v2246_v7, %v2245_v44 }
 0x59a   : > { %3209 = vmatpush3.bf16.msra.mxu0 %v2250_v49  ;;  %3279 = vmatpush3.bf16.msra.mxu1 %v2250_v49  ;;  %v2097_v46 = vmul.f32 %v4485_v37, %v4130_v20  ;;  %v2096_v47 = vmul.f32 %v4485_v37, %v4127_v19  ;;  %v2256_v48 = vpack.c.bf16 %v2248_v45, %v2247_v39 }
 0x59b   : > { %3210 = vmatprep.subr.bf16.mxu0 %v2251_v6  ;;  %3272 = vmatprep.subr.bf16.mxu1 %v2251_v6  ;;  %v2211_v11 = vmul.f32 %v4475_v10, %v4103_v9  ;;  %v2099_v63 = vmul.f32 %v4485_v37, %v4142_v25  ;;  %v2098_v62 = vmul.f32 %v4485_v37, %v4133_v21 }
 0x59c   : > { %3230 = vmatprep.mubr.bf16.mxu1 %v2229_v2  ;;  %2112 = vadd.xlane.f32.xlu1 %v2093_v58  ;;  %v2212_v51 = vmul.f32 %v4475_v10, %v4112_v13  ;;  %v2219_v52 = vmul.f32 %v4475_v10, %v4145_v26  ;;  %v2220_v53 = vmul.f32 %v4475_v10, %v4148_v27 }
 0x59d   : > { %2108 = vadd.xlane.f32.xlu0 %v2091_v43  ;;  %v2213_v9 = vmul.f32 %v4475_v10, %v4115_v14  ;;  %v2214_v25 = vmul.f32 %v4475_v10, %v4118_v15  ;;  %v2221_v21 = vmul.f32 %v4475_v10, %v4153_v29  ;;  %v2222_v13 = vmul.f32 %v4475_v10, %v4156_v30 }
 0x59e   : > { %3211 = vmatpush3.bf16.msra.mxu0 %v2251_v6  ;;  %3280 = vmatpush3.bf16.msra.mxu1 %v2251_v6  ;;  %v2101_v54 = vmul.f32 %v4485_v37, %v4148_v27  ;;  %v2100_v14 = vmul.f32 %v4485_v37, %v4145_v26  ;;  %v2226_v17 = vpack.c.bf16 %v2212_v51, %v2211_v11  ;;  %v4644_v51 = vld [vmem:[%s4733_s10] ss:$0 sm:$0xff] }
 0x59f   : > { %3212 = vmatprep.subr.bf16.mxu0 %v2252_v36  ;;  %3273 = vmatprep.subr.bf16.mxu1 %v2252_v36  ;;  %v2230_v55 = vpack.c.bf16 %v2220_v53, %v2219_v52  ;;  %v2227_v15 = vpack.c.bf16 %v2214_v25, %v2213_v9  ;;  %v2231_v56 = vpack.c.bf16 %v2222_v13, %v2221_v21 }
 0x5a0   : > { %2116 = vadd.xlane.f32.xlu1 %v2095_v16  ;;  %v2215_v57 = vmul.f32 %v4475_v10, %v4127_v19  ;;  %v2103_v59 = vmul.f32 %v4485_v37, %v4156_v30  ;;  %v2102_v27 = vmul.f32 %v4485_v37, %v4153_v29  ;;  %v2216_v26 = vmul.f32 %v4475_v10, %v4130_v20 }
 0x5a1   : > { %2114 = vadd.xlane.f32.xlu0 %v2094_v34  ;;  %v2223_v61 = vmul.f32 %v4475_v10, %v4159_v31  ;;  %v2224_v1 = vmul.f32 %v4475_v10, %v4162_v32  ;;  %v2105_v19 = vmul.f32 %v4485_v37, %v4162_v32  ;;  %v2104_v29 = vmul.f32 %v4485_v37, %v4159_v31 }
 0x5a2   : > { %3213 = vmatpush3.bf16.msra.mxu0 %v2252_v36  ;;  %3281 = vmatpush3.bf16.msra.mxu1 %v2252_v36  ;;  %v2228_v30 = vpack.c.bf16 %v2216_v26, %v2215_v57 }
 0x5a3   : > { %3214 = vmatprep.subr.bf16.mxu0 %v2253_v40  ;;  %3274 = vmatprep.subr.bf16.mxu1 %v2253_v40  ;;  %v2232_v3 = vpack.c.bf16 %v2224_v1, %v2223_v61 }
 0x5a4   : > { %2120 = vadd.xlane.f32.xlu1 %v2097_v46 }
 0x5a5   : > { %2118 = vadd.xlane.f32.xlu0 %v2096_v47 }
 0x5a6   : > { %3215 = vmatpush3.bf16.msra.mxu0 %v2253_v40  ;;  %3282 = vmatpush3.bf16.msra.mxu1 %v2253_v40 }
 0x5a7   : > { %3216 = vmatprep.subr.bf16.mxu0 %v2254_v50  ;;  %3275 = vmatprep.subr.bf16.mxu1 %v2254_v50 }
 0x5a8   : > { %2124 = vadd.xlane.f32.xlu1 %v2099_v63 }
 0x5a9   : > { %2122 = vadd.xlane.f32.xlu0 %v2098_v62 }
 0x5aa   : > { %3217 = vmatpush3.bf16.msra.mxu0 %v2254_v50  ;;  %3283 = vmatpush3.bf16.msra.mxu1 %v2254_v50 }
 0x5ab   : > { %3218 = vmatprep.subr.bf16.mxu0 %v2255_v8  ;;  %3276 = vmatprep.subr.bf16.mxu1 %v2255_v8 }
 0x5ac   : > { %2128 = vadd.xlane.f32.xlu1 %v2101_v54 }
 0x5ad   : > { %2126 = vadd.xlane.f32.xlu0 %v2100_v14 }
 0x5ae   : > { %3219 = vmatpush3.bf16.msra.mxu0 %v2255_v8  ;;  %3284 = vmatpush3.bf16.msra.mxu1 %v2255_v8 }
 0x5af   : > { %3220 = vmatprep.subr.bf16.mxu0 %v2256_v48  ;;  %3277 = vmatprep.subr.bf16.mxu1 %v2256_v48 }
 0x5b0   : > { %2132 = vadd.xlane.f32.xlu1 %v2103_v59 }
 0x5b1   : > { %2130 = vadd.xlane.f32.xlu0 %v2102_v27 }
 0x5b2   : > { %3221 = vmatpush3.bf16.msra.mxu0 %v2256_v48  ;;  %3285 = vmatpush3.bf16.msra.mxu1 %v2256_v48 }
 0x5b4   : > { %2136 = vadd.xlane.f32.xlu1 %v2105_v19 }
 0x5b5   : > { %3223 = vmatmul.mubr.bf16.vlgmr.msra.gmra.mrb[0].mxu0 %v2226_v17  ;;  %3231 = vmatmul.mubr.bf16.vlgmr.msra.gmra.mrb[0].mxu1 %v2230_v55 }
 0x5b6   : > { %3226 = vmatprep.mubr.bf16.mxu0 %v2227_v15  ;;  %3234 = vmatprep.mubr.bf16.mxu1 %v2231_v56 }
 0x5b7   : > { %2134 = vadd.xlane.f32.xlu0 %v2104_v29 }
 0x5bd   : > { %3227 = vmatmul.mubr.bf16.gmra.mrb[4].mxu0 %v2228_v30  ;;  %3235 = vmatmul.mubr.bf16.gmra.mrb[4].mxu1 %v2232_v3 }
 0x625   : > { %v4543_v20 = vpop.xlane.xlu0 %2106  ;;  %v4545_v49 = vpop.xlane.xlu1 %2110 }
 0x626   : > { %vm2140_vm3 = vcmp.gt.f32.partialorder %v4545_v49, 0.0  ;;  %vm2138_vm4 = vcmp.gt.f32.partialorder %v4543_v20, 0.0 }
 0x627   : > { %v2156_v22 = vsel %vm2140_vm3, %v4545_v49, 1.0  ;;  %v2154_v42 = vsel %vm2138_vm4, %v4543_v20, 1.0 }
 0x628   : > { %3519 = vrcp.f32 %v2156_v22 }
 0x629   : > { %v4549_v5 = vpop.xlane.xlu1 %2112  ;;  %3521 = vrcp.f32 %v2154_v42 }
 0x62a   : > { %v4547_v4 = vpop.xlane.xlu0 %2108  ;;  %vm2141_vm5 = vcmp.gt.f32.partialorder %v4549_v5, 0.0 }
 0x62b   : > { %vm2139_vm6 = vcmp.gt.f32.partialorder %v4547_v4, 0.0  ;;  %v2157_v36 = vsel %vm2141_vm5, %v4549_v5, 1.0 }
 0x62c   : > { %v2155_v2 = vsel %vm2139_vm6, %v4547_v4, 1.0  ;;  %3523 = vrcp.f32 %v2157_v36 }
 0x62d   : > { %v4553_v32 = vpop.xlane.xlu1 %2116  ;;  %3525 = vrcp.f32 %v2155_v2 }
 0x62e   : > { %v4551_v6 = vpop.xlane.xlu0 %2114  ;;  %vm2143_vm15 = vcmp.gt.f32.partialorder %v4553_v32, 0.0 }
 0x62f   : > { %vm2142_vm11 = vcmp.gt.f32.partialorder %v4551_v6, 0.0  ;;  %v2159_v8 = vsel %vm2143_vm15, %v4553_v32, 1.0 }
 0x630   : > { %v2158_v41 = vsel %vm2142_vm11, %v4551_v6, 1.0 }
 0x631   : > { %v4557_v31 = vpop.xlane.xlu1 %2120 }
 0x632   : > { %v4555_v10 = vpop.xlane.xlu0 %2118  ;;  %vm2145_vm14 = vcmp.gt.f32.partialorder %v4557_v31, 0.0  ;;  %v3520_v58 = vpop.eup %3519 }
 0x633   : > { %vm2144_vm12 = vcmp.gt.f32.partialorder %v4555_v10, 0.0  ;;  %v3522_v50 = vpop.eup %3521  ;;  %v2161_v16 = vsel %vm2145_vm14, %v4557_v31, 1.0  ;;  %v2188_v62 = vsel %vm2140_vm3, %v3520_v58, 0.0 }
 0x634   : > { %v2160_v23 = vsel %vm2144_vm12, %v4555_v10, 1.0  ;;  %v2186_v52 = vsel %vm2138_vm4, %v3522_v50, 0.0 }
 0x635   : > { %v4561_v33 = vpop.xlane.xlu1 %2124 }
 0x636   : > { %v4559_v18 = vpop.xlane.xlu0 %2122  ;;  %vm2147_vm7 = vcmp.gt.f32.partialorder %v4561_v33, 0.0  ;;  %v3524_v7 = vpop.eup %3523 }
 0x637   : > { %vm2146_vm9 = vcmp.gt.f32.partialorder %v4559_v18, 0.0  ;;  %v2163_v37 = vsel %vm2147_vm7, %v4561_v33, 1.0  ;;  %v3526_v34 = vpop.eup %3525  ;;  %v2189_v21 = vsel %vm2141_vm5, %v3524_v7, 0.0 }
 0x638   : > { %v2162_v60 = vsel %vm2146_vm9, %v4559_v18, 1.0  ;;  %3527 = vrcp.f32 %v2163_v37  ;;  %v2187_v13 = vsel %vm2139_vm6, %v3526_v34, 0.0 }
 0x639   : > { %v4576_v24 = vpop.xlane.xlu1 %2128 }
 0x63a   : > { %v4563_v12 = vpop.xlane.xlu0 %2126  ;;  %vm2149_vm10 = vcmp.gt.f32.partialorder %v4576_v24, 0.0 }
 0x63b   : > { %vm2148_vm8 = vcmp.gt.f32.partialorder %v4563_v12, 0.0  ;;  %v2165_v0 = vsel %vm2149_vm10, %v4576_v24, 1.0 }
 0x63c   : > { %v2164_v35 = vsel %vm2148_vm8, %v4563_v12, 1.0 }
 0x63d   : > { %3529 = vrcp.f32 %v2164_v35  ;;  %v4604_v40 = vpop.xlane.xlu1 %2132 }
 0x63e   : > { %v4578_v28 = vpop.xlane.xlu0 %2130  ;;  %3531 = vrcp.f32 %v2162_v60  ;;  %vm2151_vm0 = vcmp.gt.f32.partialorder %v4604_v40, 0.0 }
 0x63f   : > { %3533 = vrcp.f32 %v2165_v0  ;;  %vm2150_vm1 = vcmp.gt.f32.partialorder %v4578_v28, 0.0  ;;  %v2167_v45 = vsel %vm2151_vm0, %v4604_v40, 1.0 }
 0x640   : > { %3535 = vrcp.f32 %v2158_v41  ;;  %v2166_v47 = vsel %vm2150_vm1, %v4578_v28, 1.0 }
 0x641   : > { %v4620_v44 = vpop.xlane.xlu1 %2136  ;;  %3537 = vrcp.f32 %v2160_v23 }
 0x642   : > { %v3528_v39 = vpop.eup %3527  ;;  %vm2153_vm2 = vcmp.gt.f32.partialorder %v4620_v44, 0.0 }
 0x643   : > { %v2169_v63 = vsel %vm2153_vm2, %v4620_v44, 1.0  ;;  %v2195_v56 = vsel %vm2147_vm7, %v3528_v39, 0.0 }
 0x644   : > { %v4601_v38 = vpop.xlane.xlu0 %2134 }
 0x645   : > { %vm2152_vm13 = vcmp.gt.f32.partialorder %v4601_v38, 0.0 }
 0x646   : > { %v2168_v43 = vsel %vm2152_vm13, %v4601_v38, 1.0 }
 0x647   : > { %3539 = vrcp.f32 %v2168_v43  ;;  %v3530_v46 = vpop.eup %3529 }
 0x648   : > { %3541 = vrcp.f32 %v2161_v16  ;;  %v3532_v48 = vpop.eup %3531  ;;  %v2196_v9 = vsel %vm2148_vm8, %v3530_v46, 0.0 }
 0x649   : > { %3543 = vrcp.f32 %v2159_v8  ;;  %v3534_v11 = vpop.eup %3533  ;;  %v2194_v55 = vsel %vm2146_vm9, %v3532_v48, 0.0 }
 0x64a   : > { %3545 = vrcp.f32 %v2167_v45  ;;  %v2197_v26 = vsel %vm2149_vm10, %v3534_v11, 0.0  ;;  %v3536_v1 = vpop.eup %3535 }
 0x64b   : > { %3547 = vrcp.f32 %v2166_v47  ;;  %v3538_v4 = vpop.eup %3537  ;;  %v2190_v58 = vsel %vm2142_vm11, %v3536_v1, 0.0 }
 0x64c   : > { %3549 = vrcp.f32 %v2169_v63  ;;  %v2192_v7 = vsel %vm2144_vm12, %v3538_v4, 0.0 }
 0x651   : > { %v3540_v22 = vpop.eup %3539 }
 0x652   : > { %v3542_v41 = vpop.eup %3541  ;;  %v2200_v34 = vsel %vm2152_vm13, %v3540_v22, 0.0 }
 0x653   : > { %v3544_v43 = vpop.eup %3543  ;;  %v2193_v10 = vsel %vm2145_vm14, %v3542_v41, 0.0 }
 0x654   : > { %v3546_v39 = vpop.eup %3545 }
 0x655   : > { %v3548_v6 = vpop.eup %3547  ;;  %v2199_v22 = vsel %vm2151_vm0, %v3546_v39, 0.0 }
 0x688   : > { %v3224_v53 = vpop.f32.mrb[0].mxu0  ;;  %v3232_v25 = vpop.f32.mrb[0].mxu1 }
 0x689   : > { %v2356_v54 = vmul.f32 %v3224_v53, %v2188_v62  ;;  %v2364_v14 = vmul.f32 %v3232_v25, %v2196_v9  ;;  %v2291_v17 = vpop.f32.mrb[1].mxu0  ;;  %v2323_v15 = vpop.f32.mrb[1].mxu1 }
 0x68a   : > { %v2354_v57 = vmul.f32 %v2291_v17, %v2186_v52  ;;  %v2362_v59 = vmul.f32 %v2323_v15, %v2194_v55  ;;  %v3225_v27 = vpop.f32.mrb[2].mxu0  ;;  %v3233_v61 = vpop.f32.mrb[2].mxu1 }
 0x68b   : > { %v2379_v19 = vadd.f32 %v4644_v51, %v2356_v54  ;;  %v2387_v29 = vadd.f32 %v4644_v51, %v2364_v14  ;;  %v2357_v30 = vmul.f32 %v3225_v27, %v2189_v21  ;;  %v2365_v3 = vmul.f32 %v3233_v61, %v2197_v26  ;;  %v2294_v20 = vpop.f32.mrb[3].mxu0  ;;  %v2326_v49 = vpop.f32.mrb[3].mxu1 }
 0x68c   : > { %v2377_v5 = vadd.f32 %v4644_v51, %v2354_v57  ;;  %v2385_v18 = vadd.f32 %v4644_v51, %v2362_v59  ;;  %v2355_v33 = vmul.f32 %v2294_v20, %v2187_v13  ;;  %v2363_v12 = vmul.f32 %v2326_v49, %v2195_v56  ;;  %v3550_v54 = vpop.eup %3549 }
 0x68d   : > { %v2823_v42 = vmul.f32 -1.442695, %v2379_v19  ;;  %v2831_v24 = vmul.f32 -1.442695, %v2387_v29  ;;  %v2380_v36 = vadd.f32 %v4644_v51, %v2357_v30  ;;  %v2388_v2 = vadd.f32 %v4644_v51, %v2365_v3 }
 0x68e   : > { %v2821_v37 = vmul.f32 -1.442695, %v2377_v5  ;;  %v2829_v35 = vmul.f32 -1.442695, %v2385_v18  ;;  %v2378_v60 = vadd.f32 %v4644_v51, %v2355_v33  ;;  %v2386_v0 = vadd.f32 %v4644_v51, %v2363_v12 }
 0x68f   : > { %3551 = vpow2.f32 %v2823_v42  ;;  %v2824_v23 = vmul.f32 -1.442695, %v2380_v36  ;;  %v2832_v50 = vmul.f32 -1.442695, %v2388_v2  ;;  %v2198_v56 = vsel %vm2150_vm1, %v3548_v6, 0.0 }
 0x690   : > { %3553 = vpow2.f32 %v2831_v24  ;;  %v3228_v16 = vpop.f32.mrb[4].mxu0  ;;  %v3236_v8 = vpop.f32.mrb[4].mxu1  ;;  %v2822_v45 = vmul.f32 -1.442695, %v2378_v60  ;;  %v2830_v63 = vmul.f32 -1.442695, %v2386_v0 }
 0x691   : > { %3555 = vpow2.f32 %v2821_v37  ;;  %v2360_v46 = vmul.f32 %v3228_v16, %v2192_v7  ;;  %v2368_v47 = vmul.f32 %v3236_v8, %v2200_v34  ;;  %v2307_v48 = vpop.f32.mrb[5].mxu0  ;;  %v2339_v11 = vpop.f32.mrb[5].mxu1  ;;  %v2201_v20 = vsel %vm2153_vm2, %v3550_v54, 0.0 }
 0x692   : > { %3557 = vpow2.f32 %v2829_v35  ;;  %v2358_v62 = vmul.f32 %v2307_v48, %v2190_v58  ;;  %v3229_v52 = vpop.f32.mrb[6].mxu0  ;;  %v3237_v53 = vpop.f32.mrb[6].mxu1  ;;  %v2366_v59 = vmul.f32 %v2339_v11, %v2198_v56  ;;  %v2191_v5 = vsel %vm2143_vm15, %v3544_v43, 0.0 }
 0x693   : > { %3559 = vpow2.f32 %v2824_v23  ;;  %v2383_v38 = vadd.f32 %v4644_v51, %v2360_v46  ;;  %v2391_v9 = vadd.f32 %v4644_v51, %v2368_v47  ;;  %v2361_v25 = vmul.f32 %v3229_v52, %v2193_v10  ;;  %v2310_v21 = vpop.f32.mrb[7].mxu0  ;;  %v2342_v13 = vpop.f32.mrb[7].mxu1 }
 0x694   : > { %3561 = vpow2.f32 %v2832_v50  ;;  %v2381_v14 = vadd.f32 %v4644_v51, %v2358_v62  ;;  %v2389_v3 = vadd.f32 %v4644_v51, %v2366_v59  ;;  %v2369_v4 = vmul.f32 %v3237_v53, %v2201_v20 }
 0x695   : > { %3563 = vpow2.f32 %v2822_v45  ;;  %v2827_v17 = vmul.f32 -1.442695, %v2383_v38  ;;  %v2835_v55 = vmul.f32 -1.442695, %v2391_v9  ;;  %v2384_v31 = vadd.f32 %v4644_v51, %v2361_v25 }
 0x696   : > { %3565 = vpow2.f32 %v2830_v63  ;;  %v2825_v15 = vmul.f32 -1.442695, %v2381_v14  ;;  %v2359_v12 = vmul.f32 %v2310_v21, %v2191_v5  ;;  %v2367_v36 = vmul.f32 %v2342_v13, %v2199_v22 }
 0x697   : > { %3567 = vpow2.f32 %v2827_v17  ;;  %v2828_v57 = vmul.f32 -1.442695, %v2384_v31  ;;  %v2833_v37 = vmul.f32 -1.442695, %v2389_v3  ;;  %v2392_v32 = vadd.f32 %v4644_v51, %v2369_v4 }
 0x698   : > { %3569 = vpow2.f32 %v2835_v55  ;;  %v2382_v0 = vadd.f32 %v4644_v51, %v2359_v12  ;;  %v2390_v23 = vadd.f32 %v4644_v51, %v2367_v36 }
 0x699   : > { %v3552_v27 = vpop.eup %3551  ;;  %3571 = vpow2.f32 %v2825_v15  ;;  %v2836_v50 = vmul.f32 -1.442695, %v2392_v32 }
 0x69a   : > { %v3554_v26 = vpop.eup %3553  ;;  %v2443_v61 = vadd.f32 1.0, %v3552_v27  ;;  %3573 = vpow2.f32 %v2828_v57  ;;  %v2826_v34 = vmul.f32 -1.442695, %v2382_v0  ;;  %v2834_v39 = vmul.f32 -1.442695, %v2390_v23 }
 0x69b   : > { %v3556_v1 = vpop.eup %3555  ;;  %v2451_v19 = vadd.f32 1.0, %v3554_v26 }
 0x69c   : > { %v3558_v29 = vpop.eup %3557  ;;  %3575 = vrcp.f32 %v2443_v61  ;;  %v2441_v30 = vadd.f32 1.0, %v3556_v1 }
 0x69d   : > { %v3560_v28 = vpop.eup %3559  ;;  %3577 = vrcp.f32 %v2451_v19  ;;  %v2449_v49 = vadd.f32 1.0, %v3558_v29 }
 0x69e   : > { %v3562_v18 = vpop.eup %3561  ;;  %3579 = vrcp.f32 %v2441_v30  ;;  %v2444_v33 = vadd.f32 1.0, %v3560_v28 }
 0x69f   : > { %v3564_v42 = vpop.eup %3563  ;;  %3581 = vrcp.f32 %v2449_v49  ;;  %v2452_v24 = vadd.f32 1.0, %v3562_v18 }
 0x6a0   : > { %v3566_v44 = vpop.eup %3565  ;;  %3583 = vrcp.f32 %v2444_v33  ;;  %v2442_v2 = vadd.f32 1.0, %v3564_v42 }
 0x6a1   : > { %v3568_v35 = vpop.eup %3567  ;;  %3585 = vrcp.f32 %v2452_v24  ;;  %v2450_v60 = vadd.f32 1.0, %v3566_v44 }
 0x6a2   : > { %3587 = vrcp.f32 %v2442_v2  ;;  %v3570_v41 = vpop.eup %3569  ;;  %v2447_v40 = vadd.f32 1.0, %v3568_v35 }
 0x6a3   : > { %3589 = vrcp.f32 %v2450_v60  ;;  %v3572_v58 = vpop.eup %3571  ;;  %v2455_v53 = vadd.f32 1.0, %v3570_v41 }
 0x6a4   : > { %3591 = vpow2.f32 %v2833_v37  ;;  %v3574_v43 = vpop.eup %3573  ;;  %v2445_v38 = vadd.f32 1.0, %v3572_v58 }
 0x6a5   : > { %v2448_v16 = vadd.f32 1.0, %v3574_v43  ;;  %3593 = vrcp.f32 %v2447_v40 }
 0x6a6   : > { %v3576_v7 = vpop.eup %3575 }
 0x6a7   : > { %v3578_v8 = vpop.eup %3577  ;;  %3595 = vrcp.f32 %v2448_v16 }
 0x6a8   : > { %v3580_v45 = vpop.eup %3579  ;;  %3597 = vpow2.f32 %v2836_v50 }
 0x6a9   : > { %v3582_v46 = vpop.eup %3581  ;;  %3599 = vpow2.f32 %v2826_v34 }
 0x6aa   : > { %v3584_v47 = vpop.eup %3583  ;;  %3601 = vpow2.f32 %v2834_v39 }
 0x6ab   : > { %v3586_v48 = vpop.eup %3585  ;;  %v2881_v11 = vpack.c.bf16 %v3584_v47, %v3576_v7  ;;  %3603 = vrcp.f32 %v2455_v53 }
 0x6ac   : > { %v3588_v51 = vpop.eup %3587  ;;  %v2901_v6 = vpack.c.bf16 %v3586_v48, %v3578_v8  ;;  %3605 = vrcp.f32 %v2445_v38 }
 0x6ad   : > { %v3590_v63 = vpop.eup %3589  ;;  %2913 = vst [vmem:[#allocation17 + $0x8] sm:$0xff] %v2881_v11   ;;  %v2876_v62 = vpack.c.bf16 %v3588_v51, %v3580_v45 }
 0x6ae   : > { %v3592_v10 = vpop.eup %3591  ;;  %2917 = vst [vmem:[#allocation17 + $0x28] sm:$0xff] %v2901_v6   ;;  %v2896_v52 = vpack.c.bf16 %v3590_v63, %v3582_v46 }
 0x6af   : > { %2877 = vst [vmem:[#allocation17] sm:$0xff] %v2876_v62   ;;  %v3594_v9 = vpop.eup %3593  ;;  %v2453_v25 = vadd.f32 1.0, %v3592_v10 }
 0x6b0   : > { %2916 = vst [vmem:[#allocation17 + $0x20] sm:$0xff] %v2896_v52  }
 0x6b1   : > { %v3596_v21 = vpop.eup %3595  ;;  %3607 = vrcp.f32 %v2453_v25 }
 0x6b2   : > { %v3598_v13 = vpop.eup %3597  ;;  %v2891_v54 = vpack.c.bf16 %v3596_v21, %v3594_v9 }
 0x6b3   : > { %v3600_v14 = vpop.eup %3599  ;;  %v2456_v17 = vadd.f32 1.0, %v3598_v13 }
 0x6b4   : > { %v3602_v55 = vpop.eup %3601  ;;  %2915 = vst [vmem:[#allocation17 + $0x18] sm:$0xff] %v2891_v54   ;;  %v2446_v31 = vadd.f32 1.0, %v3600_v14 }
 0x6b5   : > { %3609 = vrcp.f32 %v2456_v17  ;;  %v2454_v15 = vadd.f32 1.0, %v3602_v55  ;;  %v3604_v56 = vpop.eup %3603 }
 0x6b6   : > { %3611 = vrcp.f32 %v2446_v31  ;;  %v3606_v57 = vpop.eup %3605 }
 0x6b7   : > { %3613 = vrcp.f32 %v2454_v15 }
 0x6bb   : > { %v3608_v59 = vpop.eup %3607 }
 0x6bf   : > { %v3610_v27 = vpop.eup %3609 }
 0x6c0   : > { %v3612_v26 = vpop.eup %3611  ;;  %v2911_v61 = vpack.c.bf16 %v3610_v27, %v3604_v56 }
 0x6c1   : > { %v3614_v1 = vpop.eup %3613  ;;  %v2886_v19 = vpack.c.bf16 %v3612_v26, %v3606_v57 }
 0x6c2   : > { %2919 = vst [vmem:[#allocation17 + $0x38] sm:$0xff] %v2911_v61   ;;  %v2906_v29 = vpack.c.bf16 %v3614_v1, %v3608_v59 }
 0x6c3   : > { %2914 = vst [vmem:[#allocation17 + $0x10] sm:$0xff] %v2886_v19  }
 0x6c4   : > { %2918 = vst [vmem:[#allocation17 + $0x30] sm:$0xff] %v2906_v29  }
 0x6c5 PF: > { %p3342_p6 = scmp.eq.s32.totalorder %s3920_s4, 2  ;;  %s3838_s22 = smov [#allocation17]  }
 0x6c6   : > { %s2585_s24 = sshll.u32 %s3838_s22, 4  ;;  %s2586_s24 = int_to_ptr.vmem [resolvable:$true] %s2585_s24 }
 0x6c7   : > { %s3755_s28 = scalar_lea.vmem %s2586_s24, 1024  ;;  %s3761_s30 = scalar_lea.vmem %s2586_s24, 2048 }
 0x6c8   : > { %p3756_p3 = scmp.ne.s32.totalorder %s2586_s24, %s3755_s28  ;;  %p3762_p11 = scmp.lt.s32.totalorder %s2586_s24, %s2586_s24 }
 0x6c9   : > { %p3763_p4 = scmp.lt.s32.totalorder %s3761_s30, %s3755_s28 }
 0x6ca   : > { %p3757_p9 = pnand %p3756_p3, %p3342_p6 }
 0x6cb   : > { %p3764_p12 = por %p3763_p4, %p3762_p11 }
 0x6cc   : > { %p3758_p10 = pneg %p3757_p9 }
 0x6ce   : > { %p3765_p13 = pnand %p3764_p12, %p3758_p10 }
 0x6d0   : > { %3768 = shalt.err (!%p3765_p13)
}
 0x6d1   : > { %s4761_s23 = sld [smem:[#allocation26_spill]] }
 0x6d7   : > { %s3769_s12 = scalar_lea.hbm %s4761_s23, 1024 }
 0x6d8   : > { %p3770_p0 = scmp.ne.s32.totalorder %s4761_s23, %s3769_s12  ;;  %p3775_p5 = scmp.lt.u32.totalorder %s3769_s12, %s4761_s23 }
 0x6da   : > { %p3771_p1 = pnand %p3770_p0, %p3342_p6 }
 0x6dc   : > { %p3772_p2 = pneg %p3771_p1 }
 0x6de   : > { %p3777_p8 = pnand %p3775_p5, %p3772_p2 }
 0x6e0   : > { %3780 = shalt.err (!%p3777_p8)
}
 0x6e1   : > { %s3839_s18 = smov 64   ;;  %s3840_s15 = smov 4  }
 0x6e2   : > { %3307 = dma.vmem_to_hbm [thread:$0]  (%p3342_p6), %s2586_s24, 1024, %s4761_s23, [#allocation10], %s3839_s18, %s3839_s18, %s3840_s15  }
 0x6e3 PF: > { %p3343_p7 = scmp.ge.s32.totalorder %s3827_s21, 2  ;;  %s4762_s16 = sadd.s32 4294967294, %s3827_s21  }
 0x6e4   : > { %p3344_p3 = scmp.eq.s32.totalorder %s4762_s16, 2 }
 0x6e6   : > { %p3328_p9 = pnand %p3344_p3, %p3343_p7 }
 0x6e8   : > { %3814 = dma.done.wait (!%p3328_p9), [#allocation10], 1024  }
 0x6e9   : > { %3816 = vsyncadd (!%p3328_p9), [#allocation10], 4294966272  ;;  %s29_s21 = sadd.s32 1, %s3827_s21   ;;  %s4763_s19 = sld [smem:[#allocation24_spill]] }
 0x6ea   : > { %p26_p10 = scmp.ge.s32.totalorder %s29_s21, 5   ;;  %s4764_s20 = sld [smem:[#allocation25_spill]] }
 0x6ec   :  { %28 = sbr.rel (!%p26_p10) target bundleno = 9 (0x9), region = 145 }
 0x6f3   :  { %2606 = vsyncpa [#allocation9], 1 }
 0x6f4   :  { %2608 = vsyncpa [#allocation9 + $0x1], 1 }
 0x6f5   :  { %2609 = vsyncpa [#allocation12], 1 }
 0x6f6   :  { %2610 = vsyncpa [#allocation16], 1 }
 0x6f7   :  { %2611 = vsyncpa [#allocation10], 1 }
 0x6f8   :  { %2613 = vsyncpa [#allocation10 + $0x1], 1 }

</bundles_post_ra>
